<compile_context>
chip_gen: v7x
topology: tpu7x:2x2x1
jax: 0.10.0
libtpu: 0.0.40
codegen_flags: <defaults>
</compile_context>

<pallas_src>
import functools

import jax
import jax.numpy as jnp
from jax import lax
from jax.experimental import pallas as pl
from jax.experimental.pallas import tpu as pltpu

_MIB = 1024 * 1024


def _vmem_capacity_bytes():
    """Physical VMEM per TensorCore, with a safe fallback (v7x floor)."""
    try:
        info = pltpu.get_tpu_info()
        cap = getattr(info, "vmem_capacity_bytes", None)
        if cap:
            return int(cap)
    except Exception:
        pass
    return 64 * _MIB


# --------------------------------------------------------------------------
# Stage 1: one-shot weight preprocessing.
#   inputs : weight (d_out, tk), lora_A^T (rank, d_out), lora_B (rank, tk),
#            m (1, tk)
#   output : calc_w_t (tk, d_out)  = (m * adapted / ||adapted||_col).T
# --------------------------------------------------------------------------
def _dora_prep_kernel(w_ref, a_t_ref, b_ref, m_ref, wt_ref):
    # lora = A @ B_tile, computed as dot_general contracting the rank dim of
    # both lane-dense operands -> (d_out, tk), all in f32.
    lora = lax.dot_general(
        a_t_ref[...].astype(jnp.float32),        # (rank, d_out)
        b_ref[...].astype(jnp.float32),          # (rank, tk)
        dimension_numbers=(((0,), (0,)), ((), ())),
        preferred_element_type=jnp.float32,
    )                                            # (d_out, tk)
    adapted = w_ref[...].astype(jnp.float32) + lora

    # Per-column scale: m * rsqrt(sum(adapted^2, axis=0)).  (No epsilon, to
    # match the PyTorch reference.)
    inv_norm = lax.rsqrt(jnp.sum(adapted * adapted, axis=0, keepdims=True))
    scale = m_ref[...].astype(jnp.float32) * inv_norm              # (1, tk)

    calc_w = adapted * scale                                        # (d_out, tk)
    # Single one-shot transpose so the main GEMM needs none.
    wt_ref[...] = jnp.transpose(calc_w).astype(wt_ref.dtype)        # (tk, d_out)


# --------------------------------------------------------------------------
# Stage 2: tiled GEMM  out = x @ calc_w_t + bias.
#   grid = (batch tiles, d_out tiles, d_in tiles), k last / arbitrary.
#   If acc_ref is None the (f32) output block itself is the accumulator.
# --------------------------------------------------------------------------
def _dora_gemm_kernel(x_ref, wt_ref, bias_ref, o_ref, acc_ref=None):
    acc = o_ref if acc_ref is None else acc_ref
    k = pl.program_id(2)

    @pl.when(k == 0)
    def _init():
        acc[...] = jnp.zeros_like(acc)

    acc[...] += jnp.dot(x_ref[...], wt_ref[...],
                        preferred_element_type=jnp.float32)

    @pl.when(k == pl.num_programs(2) - 1)
    def _finalize():
        if acc_ref is None:
            # f32 output doubles as the accumulator: just add the bias.
            o_ref[...] += bias_ref[...].astype(jnp.float32)
        else:
            o_ref[...] = (acc_ref[...]
                          + bias_ref[...].astype(jnp.float32)).astype(o_ref.dtype)


def dora_forward(x, weight, lora_A, lora_B, m, bias, *,
                 block_b=512, block_n=512, block_k=512, prep_block_k=256):
    batch, d_in = x.shape
    d_out = weight.shape[0]
    rank = lora_A.shape[1]
    mxu_dtype = x.dtype
    out_dtype = x.dtype

    cap = _vmem_capacity_bytes()

    # ---------------- Stage 1: one-shot calc_w_t = calc_weights.T ----------
    tkp = min(prep_block_k, d_in)
    assert d_in % tkp == 0, "pad d_in to a multiple of the prep k tile"
    n_kp = d_in // tkp

    lora_A_t = jnp.transpose(lora_A)          # (rank, d_out), lane-dense
    m2 = m.reshape(1, d_in)

    isz = lambda a: jnp.dtype(a.dtype).itemsize
    mxu_isz = jnp.dtype(mxu_dtype).itemsize
    pad8 = lambda n: max(8, -(-n // 8) * 8)   # sublane padding of narrow blocks

    prep_tile_bytes = (
        2 * (d_out * tkp * isz(weight)
             + pad8(rank) * d_out * isz(lora_A)
             + pad8(rank) * tkp * isz(lora_B)
             + pad8(1) * tkp * isz(m))
        + 2 * tkp * d_out * mxu_isz
    )
    assert prep_tile_bytes <= cap - 4 * _MIB, "prep tile too large for VMEM; lower prep_block_k"
    prep_vmem = int(min(cap - 4 * _MIB, max(32 * _MIB, prep_tile_bytes * 3 // 2)))

    prep_cost = pl.CostEstimate(
        flops=int(2 * rank * d_out * d_in + 5 * d_out * d_in),
        transcendentals=int(d_in),
        bytes_accessed=int(weight.size * isz(weight) + lora_A.size * isz(lora_A)
                           + lora_B.size * isz(lora_B) + m.size * isz(m)
                           + d_in * d_out * mxu_isz),
    )

    calc_w_t = pl.pallas_call(
        _dora_prep_kernel,
        out_shape=jax.ShapeDtypeStruct((d_in, d_out), mxu_dtype),
        grid_spec=pltpu.PrefetchScalarGridSpec(
            num_scalar_prefetch=0,
            grid=(n_kp,),
            in_specs=[
                pl.BlockSpec((d_out, tkp), lambda k: (0, k)),   # weight
                pl.BlockSpec((rank, d_out), lambda k: (0, 0)),  # lora_A^T (lane-dense)
                pl.BlockSpec((rank, tkp), lambda k: (0, k)),    # lora_B
                pl.BlockSpec((1, tkp), lambda k: (0, k)),       # m
            ],
            out_specs=pl.BlockSpec((tkp, d_out), lambda k: (k, 0)),
        ),
        compiler_params=pltpu.CompilerParams(
            dimension_semantics=("parallel",),
            vmem_limit_bytes=prep_vmem,
        ),
        cost_estimate=prep_cost,
    )(weight, lora_A_t, lora_B, m2)

    # ---------------- Stage 2: out = x @ calc_w_t + bias -------------------
    tb = min(block_b, batch)
    tn = min(block_n, d_out)
    tk = min(block_k, d_in)
    assert batch % tb == 0, "pad batch to a multiple of the batch tile"
    assert d_out % tn == 0, "pad d_out to a multiple of the n tile"
    assert d_in % tk == 0, "pad d_in to a multiple of the k tile"
    n_b, n_j, n_k = batch // tb, d_out // tn, d_in // tk

    bias2d = bias.reshape(1, d_out)
    accumulate_in_out = jnp.dtype(out_dtype) == jnp.dtype(jnp.float32)

    tile_bytes = (
        2 * (tb * tk * isz(x)                 # x (double-buffered)
             + tk * tn * mxu_isz              # calc_w_t tile (double-buffered)
             + pad8(1) * tn * 4)              # bias tile (sublane-padded)
        + 2 * tb * tn * jnp.dtype(out_dtype).itemsize   # output tile
        + (0 if accumulate_in_out else tb * tn * 4)     # f32 accumulator
    )
    assert tile_bytes <= cap - 4 * _MIB, "main tile too large for VMEM; lower block sizes"
    vmem_limit = int(min(cap - 4 * _MIB, max(32 * _MIB, tile_bytes * 3 // 2)))

    cost = pl.CostEstimate(
        flops=int(2 * batch * d_in * d_out),
        transcendentals=0,
        bytes_accessed=int(x.size * isz(x)
                           + n_b * d_in * d_out * mxu_isz    # weight re-streamed per batch tile
                           + d_out * 4
                           + batch * d_out * jnp.dtype(out_dtype).itemsize),
    )

    kernel = (_dora_gemm_kernel if accumulate_in_out
              else functools.partial(_dora_gemm_kernel))
    scratch = [] if accumulate_in_out else [pltpu.VMEM((tb, tn), jnp.float32)]

    grid_spec = pltpu.PrefetchScalarGridSpec(
        num_scalar_prefetch=0,
        grid=(n_b, n_j, n_k),
        in_specs=[
            pl.BlockSpec((tb, tk), lambda i, j, k: (i, k)),     # x
            pl.BlockSpec((tk, tn), lambda i, j, k: (k, j)),     # calc_w_t
            pl.BlockSpec((1, tn), lambda i, j, k: (0, j)),      # bias
        ],
        out_specs=pl.BlockSpec((tb, tn), lambda i, j, k: (i, j)),
        scratch_shapes=scratch,
    )

    return pl.pallas_call(
        kernel,
        out_shape=jax.ShapeDtypeStruct((batch, d_out), out_dtype),
        grid_spec=grid_spec,
        compiler_params=pltpu.CompilerParams(
            dimension_semantics=("parallel", "parallel", "arbitrary"),
            vmem_limit_bytes=vmem_limit,
        ),
        cost_estimate=cost,
    )(x, calc_w_t, bias2d)


def dora_reference(x, weight, lora_A, lora_B, m, bias):
    lora = lora_A @ lora_B
    adapted = weight + lora
    column_norm = jnp.sqrt(jnp.sum(adapted * adapted, axis=0, keepdims=True))
    calc_w = m * (adapted / column_norm)
    return x @ calc_w.T + bias[None, :]


if __name__ == "__main__":
    # Small deterministic setup consistent with DoRALayer(d_in, d_out, rank=4).
    # batch spans two 128-row batch tiles, d_in spans two 256-wide k tiles and
    # d_out is a 256-wide lane-dense output, so every grid axis is exercised.
    batch, d_in, d_out, rank = 256, 512, 256, 4

    key = jax.random.PRNGKey(0)
    k_w, k_b, k_a, k_bb, k_x = jax.random.split(key, 5)

    weight = jax.random.normal(k_w, (d_out, d_in), dtype=jnp.float32)
    bias = jax.random.normal(k_b, (d_out,), dtype=jnp.float32)
    # m = ||weight||_2 over dim 0, keepdim -> (1, d_in)   (module init)
    m = jnp.sqrt(jnp.sum(weight * weight, axis=0, keepdims=True))
    std_dev = 1.0 / jnp.sqrt(jnp.float32(rank))
    lora_A = jax.random.normal(k_a, (d_out, rank), dtype=jnp.float32) * std_dev
    # Non-zero lora_B (as after training) so the norm / scale path is exercised
    # non-trivially; the module's zero-init lora_B is a special case of this.
    lora_B = jax.random.normal(k_bb, (rank, d_in), dtype=jnp.float32) * 0.1
    x = jax.random.normal(k_x, (batch, d_in), dtype=jnp.float32)

    fwd = functools.partial(dora_forward, block_b=128, block_n=256,
                            block_k=256, prep_block_k=256)

    # ---- f32 path (output accumulates in-place, tight tolerance) ----
    out = jax.block_until_ready(fwd(x, weight, lora_A, lora_B, m, bias))
    ref = dora_reference(x, weight, lora_A, lora_B, m, bias)
    assert out.shape == (batch, d_out)
    assert jnp.allclose(out, ref, atol=5e-3, rtol=5e-3), "f32 mismatch vs reference"

    # ---- bf16 operand path (f32 accumulation on the MXU; loose tolerance) ----
    bf = lambda a: a.astype(jnp.bfloat16)
    out_bf = jax.block_until_ready(
        fwd(bf(x), bf(weight), bf(lora_A), bf(lora_B), bf(m), bf(bias)))
    ref_bf = dora_reference(bf(x).astype(jnp.float32), bf(weight).astype(jnp.float32),
                            bf(lora_A).astype(jnp.float32), bf(lora_B).astype(jnp.float32),
                            bf(m).astype(jnp.float32), bf(bias).astype(jnp.float32))
    assert out_bf.shape == (batch, d_out)
    assert bool(jnp.all(jnp.isfinite(out_bf.astype(jnp.float32))))
    assert jnp.allclose(out_bf.astype(jnp.float32), ref_bf, atol=1.0, rtol=1e-1), \
        "bf16 mismatch vs reference"

    print("KERNEL_OK")
</pallas_src>

<mosaic_0001>
module attributes {stable_mosaic.version = 11 : i64} {
  func.func @_dora_prep_kernel(%arg0: i32, %arg1: memref<256x256xf32, #tpu.memory_space<vmem>>, %arg2: memref<4x256xf32, #tpu.memory_space<vmem>>, %arg3: memref<4x256xf32, #tpu.memory_space<vmem>>, %arg4: memref<1x256xf32, #tpu.memory_space<vmem>>, %arg5: memref<256x256xf32, #tpu.memory_space<vmem>>) attributes {dimension_semantics = [#tpu.dimension_semantics<parallel>], iteration_bounds = array<i64: 2>, scalar_prefetch = 0 : i64, scratch_operands = 0 : i64, tpu.core_type = #tpu.core_type<tc>, window_params = [{transform_indices = @transform_0, window_bounds = array<i64: 256, 256>}, {pipeline_mode = #tpu.pipeline_mode<synchronous>, transform_indices = @transform_1, window_bounds = array<i64: 4, 256>}, {transform_indices = @transform_2, window_bounds = array<i64: 4, 256>}, {transform_indices = @transform_3, window_bounds = array<i64: 1, 256>}, {transform_indices = @transform_4, window_bounds = array<i64: 256, 256>}]} {
    %c0 = arith.constant 0 : index
    %c0_0 = arith.constant 0 : index
    %0 = vector.load %arg2[%c0, %c0_0] : memref<4x256xf32, #tpu.memory_space<vmem>>, vector<4x256xf32>
    %c0_1 = arith.constant 0 : index
    %c0_2 = arith.constant 0 : index
    %1 = vector.load %arg3[%c0_1, %c0_2] : memref<4x256xf32, #tpu.memory_space<vmem>>, vector<4x256xf32>
    %cst = arith.constant dense<0.000000e+00> : vector<256x256xf32>
    %2 = tpu.matmul %0, %1, %cst {dimension_numbers = #tpu.dot_dimension_numbers<[0], [0], [1], [1], [0, 1, 1, 1], [], []>} : vector<4x256xf32>, vector<4x256xf32>, vector<256x256xf32> -> vector<256x256xf32>
    %c0_3 = arith.constant 0 : index
    %c0_4 = arith.constant 0 : index
    %3 = vector.load %arg1[%c0_3, %c0_4] : memref<256x256xf32, #tpu.memory_space<vmem>>, vector<256x256xf32>
    %4 = arith.addf %3, %2 : vector<256x256xf32>
    %5 = arith.mulf %4, %4 : vector<256x256xf32>
    %cst_5 = arith.constant dense<0.000000e+00> : vector<256xf32>
    %6 = vector.multi_reduction <add>, %5, %cst_5 [0] : vector<256x256xf32> to vector<256xf32>
    %7 = vector.shape_cast %6 : vector<256xf32> to vector<1x256xf32>
    %8 = math.rsqrt %7 : vector<1x256xf32>
    %c0_6 = arith.constant 0 : index
    %c0_7 = arith.constant 0 : index
    %9 = vector.load %arg4[%c0_6, %c0_7] : memref<1x256xf32, #tpu.memory_space<vmem>>, vector<1x256xf32>
    %10 = arith.mulf %9, %8 : vector<1x256xf32>
    %11 = vector.broadcast %10 : vector<1x256xf32> to vector<256x256xf32>
    %12 = arith.mulf %4, %11 : vector<256x256xf32>
    %13 = tpu.transpose %12, [1, 0] : vector<256x256xf32> -> vector<256x256xf32>
    %c0_8 = arith.constant 0 : index
    %c0_9 = arith.constant 0 : index
    %14 = vector.load %arg5[%c0_8, %c0_9] : memref<256x256xf32, #tpu.memory_space<vmem>>, vector<256x256xf32>
    tpu.vector_store %arg5[%c0_8, %c0_9], %13 {strides = array<i32>} : memref<256x256xf32, #tpu.memory_space<vmem>>, vector<256x256xf32>,
    return
  }
  func.func @transform_0(%arg0: i32) -> (i32, i32) {
    %c0_i32 = arith.constant 0 : i32
    %c0_i32_0 = arith.constant 0 : i32
    return %c0_i32, %arg0 : i32, i32
  }
  func.func @transform_1(%arg0: i32) -> (i32, i32) {
    %c0_i32 = arith.constant 0 : i32
    %c0_i32_0 = arith.constant 0 : i32
    %c0_i32_1 = arith.constant 0 : i32
    return %c0_i32, %c0_i32_0 : i32, i32
  }
  func.func @transform_2(%arg0: i32) -> (i32, i32) {
    %c0_i32 = arith.constant 0 : i32
    %c0_i32_0 = arith.constant 0 : i32
    return %c0_i32, %arg0 : i32, i32
  }
  func.func @transform_3(%arg0: i32) -> (i32, i32) {
    %c0_i32 = arith.constant 0 : i32
    %c0_i32_0 = arith.constant 0 : i32
    return %c0_i32, %arg0 : i32, i32
  }
  func.func @transform_4(%arg0: i32) -> (i32, i32) {
    %c0_i32 = arith.constant 0 : i32
    %c0_i32_0 = arith.constant 0 : i32
    return %arg0, %c0_i32 : i32, i32
  }
}

</mosaic_0001>

<bundles_post_ra>
// kernel: tpu_custom_call.1
= control target key start
LH: loop header
LB: loop body
LE: loop exit
PB: predicated region body
PF: predicated region fallthrough
CT: control target
= control target key end

     0   :  { %s2644_s0 = inlined_call_operand.hbm [shape: f32[256,512], index: 0, kind: input, shape index: {}]   ;;  %s2645_s1 = inlined_call_operand.hbm [shape: f32[4,256], index: 1, kind: input, shape index: {}]   ;;  %s2646_s2 = inlined_call_operand.hbm [shape: f32[4,512], index: 2, kind: input, shape index: {}]   ;;  %s2647_s3 = inlined_call_operand.vmem [shape: f32[1,512], index: 3, kind: input, shape index: {}]   ;;  %s2648_s4 = inlined_call_operand.hbm [shape: f32[512,256], index: 4, kind: output, shape index: {}]  }
   0x1   :  { %2680 = sst [smem:[#allocation37_spill]] %s2644_s0 }
   0x2   :  { %9 = vsyncpa [#allocation3], 0 }
   0x3   :  { %11 = vsyncpa [#allocation3 + $0x1], 0 }
   0x4   :  { %12 = vsyncpa [#allocation6], 0 }
   0x5   :  { %13 = vsyncpa [#allocation4], 0 }
   0x6   :  { %15 = vsyncpa [#allocation4 + $0x1], 0  ;;  %s1735_s15 = smov 0   ;;  %s1737_s16 = smov 0  }
   0x7   :  { %s1739_s17 = smov 0   ;;  %s1741_s18 = smov 0  }
   0x8 LB: > { %s1756_s19 = sadd.s32 1, %s1697_s18   ;;  %s28_s20 = sadd.s32 1, %s1693_s17  ;;  %s1697_s18 = sphi %s1741_s18, %s2749_s18   ;;  %s1693_s17 = sphi %s1739_s17, %s2748_s17   ;;  %s1689_s16 = sphi %s1737_s16, %s2747_s16   ;;  %s1685_s15 = sphi %s1735_s15, %s2746_s15  }
   0x9   : > { %s25_s21 = ssub.s32 %s1697_s18, %s1756_s19  ;;  %p35_p0 = scmp.ne.s32.totalorder %s1693_s17, %s1689_s16 }
   0xa   : > { %p26_p1 = scmp.eq.s32.totalorder %s25_s21, 0  ;;  %p36_p2 = scmp.eq.s32.totalorder %s1697_s18, 0 }
   0xb   : > { %p1486_p4 = scmp.lt.s32.totalorder %s1697_s18, 2  ;;  %s175_s23 = sand.u32 1, %s1697_s18  }
   0xc   : > { %s1767_s22 = scalar_select %p26_p1, %s1693_s17, %s28_s20  }
   0xd   : > { %p37_p5 = por %p36_p2, %p35_p0  ;;  %s177_s24 = sand.u32 1, %s1693_s17  }
   0xe   : > { %s1402_s25 = sshll.u32 %s177_s24, 9  ;;  %s1454_s26 = sshll.u32 %s1697_s18, 8 }
   0xf   : > { %s2681_s0 = sld [smem:[#allocation37_spill]]  ;;  %s179_s30 = scalar_lea.vmem [#allocation2], %s1402_s25 }
  0x10   : > { %s186_s5 = sshll.u32 %s179_s30, 4  ;;  %p1782_p6 = pnand %p1486_p4, %p37_p5  ;;  %s1786_s5 = int_to_ptr.vmem [resolvable:$true] %s186_s5 }
  0x11   : > { %s1788_s7 = scalar_lea.sflag [#allocation3], %s175_s23 }
  0x12   : > { %s2682_s6 = scalar_select %p1782_p6, 1, 0 }
  0x13   : > { %p2650_p8 = pneg %p1782_p6 }
  0x15   : > { %s1780_s29 = scalar_lea.hbm %s2681_s0, %s1454_s26  ;;  %s1540_s11 = scalar_lea.hbm %s2681_s0, 16384 }
  0x16   : > { %s1535_s8 = scalar_lea.hbm %s1780_s29, 8192  ;;  %p1541_p11 = scmp.lt.u32.totalorder %s1780_s29, %s2681_s0 }
  0x17   : > { %p1536_p7 = scmp.ne.s32.totalorder %s1780_s29, %s1535_s8  ;;  %p1542_p12 = scmp.lt.u32.totalorder %s1540_s11, %s1535_s8 }
  0x18   : > { %p1544_p1 = scmp.lt.u32.totalorder %s1535_s8, %s1780_s29 }
  0x19   : > { %p1538_p9 = pnand %p2650_p8, %p1536_p7  ;;  %p1543_p13 = por %p1542_p12, %p1541_p11 }
  0x1b   : > { %p1539_p10 = pneg %p1538_p9  ;;  %p1545_p2 = por %p1544_p1, %p1543_p13 }
  0x1d   : > { %p1546_p4 = pnand %p1545_p2, %p1539_p10 }
  0x1f   : > { %1549 = shalt.err (!%p1546_p4)
}
  0x20   : > { %s1550_s14 = scalar_lea.vmem %s1786_s5, 8192  ;;  %s1699_s20 = smov [#allocation2]  }
  0x21   : > { %p1551_p5 = scmp.ne.s32.totalorder %s1786_s5, %s1550_s14  ;;  %s1555_s21 = sshll.u32 %s1699_s20, 4  ;;  %s1556_s21 = int_to_ptr.vmem [resolvable:$false] %s1555_s21 }
  0x22   : > { %s1557_s23 = scalar_lea.vmem %s1556_s21, 16384  ;;  %p1558_p3 = scmp.lt.s32.totalorder %s1786_s5, %s1556_s21 }
  0x23   : > { %p1553_p7 = pnand %p1551_p5, %p2650_p8  ;;  %p1559_p11 = scmp.lt.s32.totalorder %s1557_s23, %s1550_s14 }
  0x25   : > { %p1554_p9 = pneg %p1553_p7  ;;  %p1560_p12 = por %p1559_p11, %p1558_p3 }
  0x27   : > { %p1561_p13 = pnand %p1560_p12, %p1554_p9 }
  0x29   : > { %1564 = shalt.err (!%p1561_p13)
}
  0x2a   : > { %s1700_s25 = smov 512   ;;  %s1701_s26 = smov 256  }
  0x2b   : > { %s1702_s27 = smov 16   ;;  %s1817_s28 = sadd.s32 4294967295, %s1697_s18  }
  0x2c   : > { %1477 = dma.hbm_to_vmem [thread:$0]  (!%p1782_p6), %s1780_s29, 8192, %s1786_s5, %s1788_s7, %s1700_s25, %s1701_s26, %s1702_s27  }
  0x2d   : > { %s1398_s30 = sadd.s32 4294967294, %s1697_s18   ;;  %p41_p3 = scmp.ne.s32.totalorder %s1689_s16, %s1685_s15 }
  0x2e   : > { %p2649_p10 = scmp.eq.s32.totalorder %s1817_s28, 0  ;;  %p138_p1 = scmp.eq.s32.totalorder %s1817_s28, 1 }
  0x2f   : > { %p144_p2 = scmp.eq.s32.totalorder %s1398_s30, 1  ;;  %p1399_p4 = scmp.ge.s32.totalorder %s1697_s18, 1 }
  0x30   : > { %p1827_p5 = por %p2649_p10, %p41_p3  ;;  %p1834_p7 = por %p138_p1, %p35_p0 }
  0x31   : > { %p1838_p9 = por %p144_p2, %p41_p3  ;;  %p151_p11 = scmp.lt.s32.totalorder %s1697_s18, 3 }
  0x32   : > { %s2683_s8 = scalar_select %p1827_p5, 1, 0 }
  0x33   : > { %s2684_s29 = scalar_select %p1834_p7, 1, 0 }
  0x34   : > { %s2685_s5 = scalar_select %p1838_p9, 1, 0 }
  0x35   : > { %p1843_p12 = pnand %p1399_p4, %p151_p11  ;;  %s1703_s10 = smov [#allocation5]  }
  0x36   : > { %s164_s11 = sshll.u32 %s1703_s10, 4  ;;  %s1405_s12 = sshll.u32 %s177_s24, 3  ;;  %s165_s11 = int_to_ptr.vmem [resolvable:$true] %s164_s11 }
  0x37   : > { %s2686_s9 = scalar_select %p1843_p12, 1, 0 }
  0x38   : > { %p1470_p13 = pneg %p1843_p12  ;;  %s1455_s13 = sshll.u32 %s1697_s18, 7 }
  0x39   : > { %s200_s14 = scalar_lea.vmem [#allocation7], %s1405_s12  ;;  %s1861_s26 = scalar_lea.hbm %s2646_s2, %s1455_s13 }
  0x3a   : > { %s208_s20 = sshll.u32 %s200_s14, 4  ;;  %p1854_p0 = pnand %p1470_p13, %p2649_p10  ;;  %s1863_s20 = int_to_ptr.vmem [resolvable:$true] %s208_s20 }
  0x3b   : > { %s1565_s30 = scalar_lea.hbm %s2645_s1, 128 }
  0x3c   : > { %p1566_p3 = scmp.ne.s32.totalorder %s2645_s1, %s1565_s30  ;;  %p1567_p1 = pneg %p1854_p0 }
  0x3d   : > { %p1572_p11 = scmp.lt.u32.totalorder %s1565_s30, %s2645_s1 }
  0x3e   : > { %p1568_p2 = pnand %p1567_p1, %p1566_p3 }
  0x40   : > { %p1569_p4 = pneg %p1568_p2 }
  0x42   : > { %p1574_p13 = pnand %p1572_p11, %p1569_p4 }
  0x44   : > { %1577 = shalt.err (!%p1574_p13)
}
  0x45   : > { %s1578_s13 = scalar_lea.vmem %s165_s11, 128  ;;  %p1586_p7 = scmp.lt.s32.totalorder %s165_s11, %s165_s11 }
  0x46   : > { %p1579_p10 = scmp.ne.s32.totalorder %s165_s11, %s1578_s13  ;;  %p1587_p5 = scmp.lt.s32.totalorder %s1578_s13, %s1578_s13 }
  0x48   : > { %p1581_p8 = pnand %p1579_p10, %p1567_p1  ;;  %p1588_p12 = por %p1587_p5, %p1586_p7 }
  0x4a   : > { %p1582_p9 = pneg %p1581_p8 }
  0x4c   : > { %p1589_p6 = pnand %p1588_p12, %p1582_p9 }
  0x4e   : > { %1592 = shalt.err (!%p1589_p6)
}
  0x4f   : > { %1473 = dma.hbm_to_vmem [thread:$0]  (!%p1854_p0), %s2645_s1, 128, %s165_s11, [#allocation6]  }
  0x50   : > { %s1593_s0 = scalar_lea.hbm %s1861_s26, 128  ;;  %p2688_p10 = scmp.ne.s32.totalorder %s2682_s6, 0 }
  0x51   : > { %p1594_p3 = scmp.ne.s32.totalorder %s1861_s26, %s1593_s0  ;;  %s1598_s30 = scalar_lea.hbm %s2646_s2, 256 }
  0x52   : > { %p2689_p8 = pneg %p2688_p10  ;;  %p1599_p6 = scmp.lt.u32.totalorder %s1861_s26, %s2646_s2 }
  0x53   : > { %p1600_p5 = scmp.lt.u32.totalorder %s1598_s30, %s1593_s0  ;;  %p1602_p9 = scmp.lt.u32.totalorder %s1593_s0, %s1861_s26 }
  0x54   : > { %p1596_p1 = pnand %p1594_p3, %p2689_p8 }
  0x55   : > { %p1601_p7 = por %p1600_p5, %p1599_p6 }
  0x56   : > { %p1597_p2 = pneg %p1596_p1 }
  0x57   : > { %p1603_p12 = por %p1602_p9, %p1601_p7 }
  0x59   : > { %p1604_p4 = pnand %p1603_p12, %p1597_p2 }
  0x5b   : > { %1607 = shalt.err (!%p1604_p4)
}
  0x5c   : > { %s1608_s11 = scalar_lea.vmem %s1863_s20, 128  ;;  %p2690_p11 = pmov %p2689_p8 }
  0x5d   : > { %p1609_p0 = scmp.ne.s32.totalorder %s1863_s20, %s1608_s11  ;;  %s1704_s12 = smov [#allocation7]  }
  0x5e   : > { %s1613_s14 = sshll.u32 %s1704_s12, 4  ;;  %s1614_s14 = int_to_ptr.vmem [resolvable:$false] %s1613_s14 }
  0x5f   : > { %p1611_p13 = pnand %p1609_p0, %p2690_p11  ;;  %s1615_s13 = scalar_lea.vmem %s1614_s14, 256 }
  0x60   : > { %p1616_p8 = scmp.lt.s32.totalorder %s1863_s20, %s1614_s14  ;;  %p1617_p1 = scmp.lt.s32.totalorder %s1615_s13, %s1608_s11 }
  0x61   : > { %p1612_p3 = pneg %p1611_p13 }
  0x62   : > { %p1618_p6 = por %p1617_p1, %p1616_p8 }
  0x64   : > { %p1619_p5 = pnand %p1618_p6, %p1612_p3 }
  0x66   : > { %1622 = shalt.err (!%p1619_p5)
}
  0x67   : > { %1480 = dma.hbm_to_vmem [thread:$0]  (!%p2688_p10), %s1861_s26, 128, %s1863_s20, %s1788_s7  }
  0x68   : > { %p2691_p2 = scmp.ne.s32.totalorder %s2686_s9, 0 }
  0x6a   : > { %225 = sbr.rel (%p2691_p2) target bundleno = 967 (0x3c7), region = 36 }
  0x71   : > { %s227_s23 = sand.u32 1, %s1817_s28   ;;  %s1909_s25 = sand.u32 1, %s1689_s16  }
  0x72   : > { %s1409_s0 = sshll.u32 %s1909_s25, 9  ;;  %s228_s24 = scalar_lea.sflag [#allocation3], %s227_s23 }
  0x73   : > { %s1914_s27 = scalar_lea.vmem [#allocation2], %s1409_s0  ;;  %p2692_p7 = scmp.ne.s32.totalorder %s2683_s8, 0 }
  0x75   : > { %1668 = dma.done.wait (%p2692_p7), %s228_s24, 8192  }
  0x76   : > { %1670 = vsyncadd (%p2692_p7), %s228_s24, 4294959104  ;;  %p2693_p10 = scmp.eq.s32.totalorder %s1817_s28, 0 }
  0x78   : > { %1672 = dma.done.wait (%p2693_p10), [#allocation6], 128   ;;  %p2694_p9 = pmov %p2693_p10 }
  0x79   : > { %s1411_s6 = sshll.u32 %s1909_s25, 3 }
  0x7a   : > { %1674 = vsyncadd (%p2694_p9), [#allocation6], 4294967168  ;;  %s244_s7 = scalar_lea.vmem [#allocation7], %s1411_s6 }
  0x7b   : > { %1676 = dma.done.wait (%p2692_p7), %s228_s24, 128  }
  0x7c   : > { %1678 = vsyncadd (%p2692_p7), %s228_s24, 4294967168  ;;  %v1705_v0 = vmov 0.0   ;;  %v286_v1 = vld [vmem:[#allocation5] sm:$0xff]  ;;  %v287_v2 = vld [vmem:[%s244_s7] sm:$0xff]  ;;  %vm454_vm0 = vcmask 1043456   ;;  %vm357_vm1 = vcmask 31744  }
  0x7d   : > { %523 = vmatprep.mubr.f32.mxu0 %v1705_v0  ;;  %619 = vmatprep.mubr.f32.mxu1 %v1705_v0  ;;  %v356_v3 = vcombine.high %v287_v2, %v287_v2  ;;  %v289_v4 = vcombine.high %v286_v1, %v286_v1  ;;  %v718_v63 = vld [vmem:[%s1914_s27 + $0x10] sm:$0xff]  ;;  %s1413_s8 = sshll.u32 %s1817_s28, 1  ;;  %s2502_s30 = scalar_lea.vmem [#allocation8], %s1409_s0 }
  0x7e   : > { %291 = vxpose.xlu0.b32.start.end [1/1] (short) %v286_v1, 128  ;;  %v719_v1 = vld [vmem:[%s1914_s27 + $0x18] sm:$0xff]  ;;  %p281_p12 = scmp.lt.s32.totalorder %s1413_s8, 3  ;;  %s1457_s21 = sshll.u32 %s1817_s28, 13 }
  0x7f   : > { %1414 = vmatprep.subr.msk.mxu0 %vm454_vm0, %v356_v3  ;;  %1458 = vmatprep.subr.msk.mxu1 %vm454_vm0, %v356_v3  ;;  %v716_v3 = vld [vmem:[%s1914_s27] sm:$0xff]  ;;  %s1286_s10 = sshll.u32 %s2502_s30, 4  ;;  %s2597_s14 = scalar_lea.hbm %s2648_s4, %s1457_s21  ;;  %s2599_s10 = int_to_ptr.vmem [resolvable:$true] %s1286_s10 }
  0x80   : > { %1415 = vmatpush1.msk.msra.mxu0 %vm454_vm0, %v287_v2  ;;  %1459 = vmatpush1.msk.msra.mxu1 %vm454_vm0, %v287_v2  ;;  %s2751_s8 = smov (!%p281_p12, %s1413_s8), 3  ;;  %s1272_s13 = scalar_lea.sflag [#allocation4], %s1909_s25 }
  0x81   : > { %s283_s26 = scalar_lea.vmem %s2647_s3, %s2751_s8  ;;  %s1623_s23 = scalar_lea.vmem %s2599_s10, 8192 }
  0x82   : > { %p1624_p4 = scmp.ne.s32.totalorder %s2599_s10, %s1623_s23  ;;  %p2743_p0 = scmp.ne.s32.totalorder %s2684_s29, 0 }
  0x83   : > { %s1707_s28 = smov [#allocation8]  }
  0x84   : > { %p1625_p11 = pnand %p1624_p4, %p2743_p0  ;;  %s1627_s0 = sshll.u32 %s1707_s28, 4  ;;  %s1628_s0 = int_to_ptr.vmem [resolvable:$false] %s1627_s0 }
  0x85   : > { %s1629_s24 = scalar_lea.vmem %s1628_s0, 16384  ;;  %p1630_p3 = scmp.lt.s32.totalorder %s2599_s10, %s1628_s0 }
  0x86   : > { %p1626_p13 = pneg %p1625_p11  ;;  %p1631_p8 = scmp.lt.s32.totalorder %s1629_s24, %s1623_s23 }
  0x88   : > { %p1632_p1 = por %p1631_p8, %p1630_p3 }
  0x8a   : > { %p1633_p6 = pnand %p1632_p1, %p1626_p13 }
  0xbb   : > { %323 = vxpose.xlu0.b32.start.end [1/1] (short) %v289_v4, 128  ;;  %v720_v4 = vld [vmem:[%s1914_s27 + $0x20] sm:$0xff] }
  0xfe   : > { %v307_v5 = vpop.trf.xlu0 }
  0xff   : > { %1416 = vmatmul.mubr.msk.f32.vlgmr.msra.gmra.mrb[0].mxu0 %vm357_vm1, %v307_v5  ;;  %v717_v5 = vld [vmem:[%s1914_s27 + $0x8] sm:$0xff] }
 0x100   : > { %529 = vmatprep.mubr.f32.mxu0 %v1705_v0 }
 0x102   : > { %v308_v6 = vpop.trf.xlu0 }
 0x103   : > { %1417 = vmatmul.mubr.msk.f32.gmra.mrb[2].mxu0 %vm357_vm1, %v308_v6 }
 0x104   : > { %535 = vmatprep.mubr.f32.mxu0 %v1705_v0 }
 0x106   : > { %v309_v7 = vpop.trf.xlu0 }
 0x107   : > { %1418 = vmatmul.mubr.msk.f32.gmra.mrb[4].mxu0 %vm357_vm1, %v309_v7  ;;  %v721_v7 = vld [vmem:[%s1914_s27 + $0x28] sm:$0xff] }
 0x108   : > { %541 = vmatprep.mubr.f32.mxu0 %v1705_v0 }
 0x10a   : > { %v310_v8 = vpop.trf.xlu0 }
 0x10b   : > { %1419 = vmatmul.mubr.msk.f32.gmra.mrb[6].mxu0 %vm357_vm1, %v310_v8 }
 0x10c   : > { %547 = vmatprep.mubr.f32.mxu0 %v1705_v0 }
 0x10e   : > { %v311_v9 = vpop.trf.xlu0 }
 0x10f   : > { %1420 = vmatmul.mubr.msk.f32.gmra.mrb[8].mxu0 %vm357_vm1, %v311_v9  ;;  %v722_v9 = vld [vmem:[%s1914_s27 + $0x30] sm:$0xff] }
 0x110   : > { %553 = vmatprep.mubr.f32.mxu0 %v1705_v0 }
 0x112   : > { %v312_v10 = vpop.trf.xlu0 }
 0x113   : > { %1421 = vmatmul.mubr.msk.f32.gmra.mrb[10].mxu0 %vm357_vm1, %v312_v10 }
 0x114   : > { %559 = vmatprep.mubr.f32.mxu0 %v1705_v0 }
 0x116   : > { %v313_v11 = vpop.trf.xlu0 }
 0x117   : > { %1422 = vmatmul.mubr.msk.f32.gmra.mrb[12].mxu0 %vm357_vm1, %v313_v11 }
 0x118   : > { %565 = vmatprep.mubr.f32.mxu0 %v1705_v0 }
 0x11a   : > { %v314_v12 = vpop.trf.xlu0 }
 0x11b   : > { %1423 = vmatmul.mubr.msk.f32.gmra.mrb[14].mxu0 %vm357_vm1, %v314_v12 }
 0x11c   : > { %571 = vmatprep.mubr.f32.mxu0 %v1705_v0 }
 0x11e   : > { %v315_v13 = vpop.trf.xlu0 }
 0x11f   : > { %1424 = vmatmul.mubr.msk.f32.gmra.mrb[16].mxu0 %vm357_vm1, %v315_v13  ;;  %v723_v13 = vld [vmem:[%s1914_s27 + $0x38] sm:$0xff] }
 0x120   : > { %577 = vmatprep.mubr.f32.mxu0 %v1705_v0 }
 0x122   : > { %v316_v14 = vpop.trf.xlu0 }
 0x123   : > { %1425 = vmatmul.mubr.msk.f32.gmra.mrb[18].mxu0 %vm357_vm1, %v316_v14 }
 0x124   : > { %583 = vmatprep.mubr.f32.mxu0 %v1705_v0 }
 0x126   : > { %v317_v15 = vpop.trf.xlu0 }
 0x127   : > { %1426 = vmatmul.mubr.msk.f32.gmra.mrb[20].mxu0 %vm357_vm1, %v317_v15 }
 0x128   : > { %589 = vmatprep.mubr.f32.mxu0 %v1705_v0 }
 0x12a   : > { %v318_v16 = vpop.trf.xlu0 }
 0x12b   : > { %1427 = vmatmul.mubr.msk.f32.gmra.mrb[22].mxu0 %vm357_vm1, %v318_v16 }
 0x12c   : > { %595 = vmatprep.mubr.f32.mxu0 %v1705_v0 }
 0x12e   : > { %v319_v17 = vpop.trf.xlu0 }
 0x12f   : > { %1428 = vmatmul.mubr.msk.f32.gmra.mrb[24].mxu0 %vm357_vm1, %v319_v17  ;;  %v724_v17 = vld [vmem:[%s1914_s27 + $0x40] sm:$0xff] }
 0x130   : > { %601 = vmatprep.mubr.f32.mxu0 %v1705_v0 }
 0x132   : > { %v320_v18 = vpop.trf.xlu0 }
 0x133   : > { %1429 = vmatmul.mubr.msk.f32.gmra.mrb[26].mxu0 %vm357_vm1, %v320_v18 }
 0x134   : > { %607 = vmatprep.mubr.f32.mxu0 %v1705_v0 }
 0x136   : > { %v321_v19 = vpop.trf.xlu0 }
 0x137   : > { %1430 = vmatmul.mubr.msk.f32.gmra.mrb[28].mxu0 %vm357_vm1, %v321_v19 }
 0x138   : > { %613 = vmatprep.mubr.f32.mxu0 %v1705_v0 }
 0x13a   : > { %v322_v20 = vpop.trf.xlu0 }
 0x13b   : > { %1431 = vmatmul.mubr.msk.f32.gmra.mrb[30].mxu0 %vm357_vm1, %v322_v20  ;;  %v725_v20 = vld [vmem:[%s1914_s27 + $0x48] sm:$0xff] }
 0x13e   : > { %v339_v21 = vpop.trf.xlu0 }
 0x13f   : > { %1432 = vmatmul.mubr.msk.f32.vlgmr.msra.gmra.mrb[0].mxu1 %vm357_vm1, %v339_v21 }
 0x140   : > { %625 = vmatprep.mubr.f32.mxu1 %v1705_v0 }
 0x142   : > { %v340_v22 = vpop.trf.xlu0 }
 0x143   : > { %1433 = vmatmul.mubr.msk.f32.gmra.mrb[2].mxu1 %vm357_vm1, %v340_v22 }
 0x144   : > { %631 = vmatprep.mubr.f32.mxu1 %v1705_v0 }
 0x146   : > { %v341_v23 = vpop.trf.xlu0 }
 0x147   : > { %1434 = vmatmul.mubr.msk.f32.gmra.mrb[4].mxu1 %vm357_vm1, %v341_v23  ;;  %v726_v23 = vld [vmem:[%s1914_s27 + $0x50] sm:$0xff] }
 0x148   : > { %637 = vmatprep.mubr.f32.mxu1 %v1705_v0 }
 0x14a   : > { %v342_v24 = vpop.trf.xlu0 }
 0x14b   : > { %1435 = vmatmul.mubr.msk.f32.gmra.mrb[6].mxu1 %vm357_vm1, %v342_v24 }
 0x14c   : > { %643 = vmatprep.mubr.f32.mxu1 %v1705_v0 }
 0x14e   : > { %v343_v25 = vpop.trf.xlu0 }
 0x14f   : > { %1436 = vmatmul.mubr.msk.f32.gmra.mrb[8].mxu1 %vm357_vm1, %v343_v25 }
 0x150   : > { %649 = vmatprep.mubr.f32.mxu1 %v1705_v0 }
 0x152   : > { %v344_v26 = vpop.trf.xlu0 }
 0x153   : > { %1437 = vmatmul.mubr.msk.f32.gmra.mrb[10].mxu1 %vm357_vm1, %v344_v26 }
 0x154   : > { %655 = vmatprep.mubr.f32.mxu1 %v1705_v0 }
 0x156   : > { %v345_v27 = vpop.trf.xlu0 }
 0x157   : > { %1438 = vmatmul.mubr.msk.f32.gmra.mrb[12].mxu1 %vm357_vm1, %v345_v27 }
 0x158   : > { %661 = vmatprep.mubr.f32.mxu1 %v1705_v0 }
 0x15a   : > { %v346_v28 = vpop.trf.xlu0 }
 0x15b   : > { %1439 = vmatmul.mubr.msk.f32.gmra.mrb[14].mxu1 %vm357_vm1, %v346_v28  ;;  %v727_v28 = vld [vmem:[%s1914_s27 + $0x58] sm:$0xff] }
 0x15c   : > { %667 = vmatprep.mubr.f32.mxu1 %v1705_v0 }
 0x15e   : > { %v347_v29 = vpop.trf.xlu0 }
 0x15f   : > { %1440 = vmatmul.mubr.msk.f32.gmra.mrb[16].mxu1 %vm357_vm1, %v347_v29 }
 0x160   : > { %673 = vmatprep.mubr.f32.mxu1 %v1705_v0 }
 0x162   : > { %v348_v30 = vpop.trf.xlu0 }
 0x163   : > { %1441 = vmatmul.mubr.msk.f32.gmra.mrb[18].mxu1 %vm357_vm1, %v348_v30 }
 0x164   : > { %679 = vmatprep.mubr.f32.mxu1 %v1705_v0 }
 0x166   : > { %v349_v31 = vpop.trf.xlu0 }
 0x167   : > { %1442 = vmatmul.mubr.msk.f32.gmra.mrb[20].mxu1 %vm357_vm1, %v349_v31 }
 0x168   : > { %685 = vmatprep.mubr.f32.mxu1 %v1705_v0 }
 0x16a   : > { %v350_v32 = vpop.trf.xlu0 }
 0x16b   : > { %1443 = vmatmul.mubr.msk.f32.gmra.mrb[22].mxu1 %vm357_vm1, %v350_v32 }
 0x16c   : > { %691 = vmatprep.mubr.f32.mxu1 %v1705_v0 }
 0x16e   : > { %v351_v33 = vpop.trf.xlu0 }
 0x16f   : > { %1444 = vmatmul.mubr.msk.f32.gmra.mrb[24].mxu1 %vm357_vm1, %v351_v33  ;;  %v728_v33 = vld [vmem:[%s1914_s27 + $0x60] sm:$0xff] }
 0x170   : > { %697 = vmatprep.mubr.f32.mxu1 %v1705_v0 }
 0x172   : > { %v352_v34 = vpop.trf.xlu0 }
 0x173   : > { %1445 = vmatmul.mubr.msk.f32.gmra.mrb[26].mxu1 %vm357_vm1, %v352_v34 }
 0x174   : > { %703 = vmatprep.mubr.f32.mxu1 %v1705_v0 }
 0x176   : > { %v353_v35 = vpop.trf.xlu0 }
 0x177   : > { %1446 = vmatmul.mubr.msk.f32.gmra.mrb[28].mxu1 %vm357_vm1, %v353_v35 }
 0x178   : > { %709 = vmatprep.mubr.f32.mxu1 %v1705_v0 }
 0x17a   : > { %v354_v36 = vpop.trf.xlu0 }
 0x17b   : > { %1447 = vmatmul.mubr.msk.f32.gmra.mrb[30].mxu1 %vm357_vm1, %v354_v36 }
 0x1d2   : > { %v525_v37 = vpop.f32.mrb[0].mxu0 }
 0x1d3   : > { %v527_v38 = vpop.f32.mrb[1].mxu0  ;;  %v2036_v11 = vadd.f32 %v716_v3, %v525_v37  ;;  %v729_v37 = vld [vmem:[%s1914_s27 + $0x68] sm:$0xff]  ;;  %v732_v3 = vld [vmem:[%s1914_s27 + $0x80] sm:$0xff] }
 0x1d4   : > { %v2043_v15 = vadd.f32 %v717_v5, %v527_v38 }
 0x1d5   : > { %v844_v25 = vmul.f32 %v2036_v11, %v2036_v11 }
 0x1d6   : > { %v531_v39 = vpop.f32.mrb[2].mxu0  ;;  %v845_v30 = vmul.f32 %v2043_v15, %v2043_v15 }
 0x1d7   : > { %v533_v40 = vpop.f32.mrb[3].mxu0  ;;  %v2028_v6 = vadd.f32 %v718_v63, %v531_v39 }
 0x1d8   : > { %v2031_v8 = vadd.f32 %v719_v1, %v533_v40 }
 0x1d9   : > { %v846_v18 = vmul.f32 %v2028_v6, %v2028_v6 }
 0x1da   : > { %v537_v41 = vpop.f32.mrb[4].mxu0  ;;  %v847_v21 = vmul.f32 %v2031_v8, %v2031_v8 }
 0x1db   : > { %v539_v42 = vpop.f32.mrb[5].mxu0  ;;  %v2038_v12 = vadd.f32 %v720_v4, %v537_v41  ;;  %v908_v34 = vadd.f32 %v846_v18, %v844_v25  ;;  %v730_v41 = vld [vmem:[%s1914_s27 + $0x70] sm:$0xff] }
 0x1dc   : > { %v2045_v16 = vadd.f32 %v721_v7, %v539_v42  ;;  %v945_v38 = vadd.f32 %v847_v21, %v845_v30  ;;  %v733_v7 = vld [vmem:[%s1914_s27 + $0x88] sm:$0xff]  ;;  %v736_v30 = vld [vmem:[%s1914_s27 + $0xa0] sm:$0xff] }
 0x1dd   : > { %v848_v26 = vmul.f32 %v2038_v12, %v2038_v12 }
 0x1de   : > { %v543_v43 = vpop.f32.mrb[6].mxu0  ;;  %v849_v31 = vmul.f32 %v2045_v16, %v2045_v16 }
 0x1df   : > { %v545_v44 = vpop.f32.mrb[7].mxu0  ;;  %v2050_v19 = vadd.f32 %v722_v9, %v543_v43  ;;  %v909_v43 = vadd.f32 %v908_v34, %v848_v26  ;;  %v737_v34 = vld [vmem:[%s1914_s27 + $0xa8] sm:$0xff] }
 0x1e0   : > { %v2055_v22 = vadd.f32 %v723_v13, %v545_v44  ;;  %v946_v63 = vadd.f32 %v945_v38, %v849_v31 }
 0x1e1   : > { %v850_v35 = vmul.f32 %v2050_v19, %v2050_v19 }
 0x1e2   : > { %v549_v45 = vpop.f32.mrb[8].mxu0  ;;  %2695 = vst [vmem:[#allocation13_spill] sm:$0xff] %v2055_v22  ;;  %v851_v39 = vmul.f32 %v2055_v22, %v2055_v22 }
 0x1e3   : > { %v551_v46 = vpop.f32.mrb[9].mxu0  ;;  %v2064_v27 = vadd.f32 %v724_v17, %v549_v45  ;;  %v910_v4 = vadd.f32 %v909_v43, %v850_v35 }
 0x1e4   : > { %v2073_v32 = vadd.f32 %v725_v20, %v551_v46  ;;  %v731_v46 = vld [vmem:[%s1914_s27 + $0x78] sm:$0xff]  ;;  %v947_v9 = vadd.f32 %v946_v63, %v851_v39 }
 0x1e5   : > { %v852_v44 = vmul.f32 %v2064_v27, %v2064_v27 }
 0x1e6   : > { %v555_v47 = vpop.f32.mrb[10].mxu0  ;;  %2696 = vst [vmem:[#allocation14_spill] sm:$0xff] %v2073_v32  ;;  %v853_v1 = vmul.f32 %v2073_v32, %v2073_v32 }
 0x1e7   : > { %v557_v48 = vpop.f32.mrb[11].mxu0  ;;  %v2078_v36 = vadd.f32 %v726_v23, %v555_v47  ;;  %v911_v20 = vadd.f32 %v910_v4, %v852_v44  ;;  %v735_v23 = vld [vmem:[%s1914_s27 + $0x98] sm:$0xff] }
 0x1e8   : > { %v2083_v40 = vadd.f32 %v727_v28, %v557_v48  ;;  %v948_v26 = vadd.f32 %v947_v9, %v853_v1  ;;  %v739_v44 = vld [vmem:[%s1914_s27 + $0xb8] sm:$0xff] }
 0x1e9   : > { %v854_v5 = vmul.f32 %v2078_v36, %v2078_v36 }
 0x1ea   : > { %v561_v49 = vpop.f32.mrb[12].mxu0  ;;  %2697 = vst [vmem:[#allocation15_spill] sm:$0xff] %v2083_v40  ;;  %v855_v13 = vmul.f32 %v2083_v40, %v2083_v40 }
 0x1eb   : > { %v1993_v50 = vpop.f32.mrb[13].mxu0  ;;  %v2090_v45 = vadd.f32 %v728_v33, %v561_v49  ;;  %v912_v31 = vadd.f32 %v911_v20, %v854_v5 }
 0x1ec   : > { %v2098_v48 = vadd.f32 %v729_v37, %v1993_v50  ;;  %v734_v50 = vld [vmem:[%s1914_s27 + $0x90] sm:$0xff]  ;;  %v949_v35 = vadd.f32 %v948_v26, %v855_v13  ;;  %v743_v26 = vld [vmem:[%s1914_s27 + $0xd8] sm:$0xff] }
 0x1ed   : > { %v856_v21 = vmul.f32 %v2090_v45, %v2090_v45 }
 0x1ee   : > { %v1995_v51 = vpop.f32.mrb[14].mxu0  ;;  %2698 = vst [vmem:[#allocation16_spill] sm:$0xff] %v2098_v48 }
 0x1ef   : > { %v1997_v52 = vpop.f32.mrb[15].mxu0  ;;  %v2104_v49 = vadd.f32 %v730_v41, %v1995_v51  ;;  %v913_v41 = vadd.f32 %v912_v31, %v856_v21 }
 0x1f0   : > { %v2110_v17 = vadd.f32 %v731_v46, %v1997_v52  ;;  %v857_v52 = vmul.f32 %v2098_v48, %v2098_v48 }
 0x1f1   : > { %v858_v33 = vmul.f32 %v2104_v49, %v2104_v49 }
 0x1f2   : > { %v1999_v53 = vpop.f32.mrb[16].mxu0  ;;  %2699 = vst [vmem:[#allocation17_spill] sm:$0xff] %v2110_v17  ;;  %v859_v37 = vmul.f32 %v2110_v17, %v2110_v17  ;;  %v950_v63 = vadd.f32 %v949_v35, %v857_v52 }
 0x1f3   : > { %v2001_v54 = vpop.f32.mrb[17].mxu0  ;;  %v2118_v51 = vadd.f32 %v732_v3, %v1999_v53  ;;  %v740_v3 = vld [vmem:[%s1914_s27 + $0xc0] sm:$0xff]  ;;  %v914_v4 = vadd.f32 %v913_v41, %v858_v33 }
 0x1f4   : > { %v2126_v28 = vadd.f32 %v733_v7, %v2001_v54  ;;  %v738_v54 = vld [vmem:[%s1914_s27 + $0xb0] sm:$0xff]  ;;  %v741_v7 = vld [vmem:[%s1914_s27 + $0xc8] sm:$0xff]  ;;  %v951_v9 = vadd.f32 %v950_v63, %v859_v37  ;;  %v744_v33 = vld [vmem:[%s1914_s27 + $0xe0] sm:$0xff] }
 0x1f5   : > { %v860_v43 = vmul.f32 %v2118_v51, %v2118_v51  ;;  %v745_v37 = vld [vmem:[%s1914_s27 + $0xe8] sm:$0xff] }
 0x1f6   : > { %v2003_v55 = vpop.f32.mrb[18].mxu0  ;;  %2700 = vst [vmem:[#allocation18_spill] sm:$0xff] %v2126_v28 }
 0x1f7   : > { %v2005_v56 = vpop.f32.mrb[19].mxu0  ;;  %v2132_v53 = vadd.f32 %v734_v50, %v2003_v55  ;;  %v915_v21 = vadd.f32 %v914_v4, %v860_v43 }
 0x1f8   : > { %v2138_v38 = vadd.f32 %v735_v23, %v2005_v56  ;;  %v861_v56 = vmul.f32 %v2126_v28, %v2126_v28 }
 0x1f9   : > { %v862_v5 = vmul.f32 %v2132_v53, %v2132_v53 }
 0x1fa   : > { %v2007_v57 = vpop.f32.mrb[20].mxu0  ;;  %2701 = vst [vmem:[#allocation19_spill] sm:$0xff] %v2138_v38  ;;  %v863_v13 = vmul.f32 %v2138_v38, %v2138_v38 }
 0x1fb   : > { %v2009_v58 = vpop.f32.mrb[21].mxu0  ;;  %v2146_v55 = vadd.f32 %v736_v30, %v2007_v57  ;;  %v952_v30 = vadd.f32 %v951_v9, %v861_v56  ;;  %v748_v9 = vld [vmem:[%s1914_s27 + $0x100] sm:$0xff] }
 0x1fc   : > { %v2154_v1 = vadd.f32 %v737_v34, %v2009_v58  ;;  %v742_v58 = vld [vmem:[%s1914_s27 + $0xd0] sm:$0xff]  ;;  %v916_v34 = vadd.f32 %v915_v21, %v862_v5 }
 0x1fd   : > { %v864_v23 = vmul.f32 %v2146_v55, %v2146_v55 }
 0x1fe   : > { %v2011_v59 = vpop.f32.mrb[22].mxu0  ;;  %2702 = vst [vmem:[#allocation20_spill] sm:$0xff] %v2154_v1 }
 0x1ff   : > { %v2013_v60 = vpop.f32.mrb[23].mxu0  ;;  %v2160_v57 = vadd.f32 %v738_v54, %v2011_v59  ;;  %v953_v54 = vadd.f32 %v952_v30, %v863_v13  ;;  %v917_v63 = vadd.f32 %v916_v34, %v864_v23 }
 0x200   : > { %v2166_v50 = vadd.f32 %v739_v44, %v2013_v60  ;;  %v865_v60 = vmul.f32 %v2154_v1, %v2154_v1 }
 0x201   : > { %v866_v35 = vmul.f32 %v2160_v57, %v2160_v57 }
 0x202   : > { %v2015_v61 = vpop.f32.mrb[24].mxu0  ;;  %2703 = vst [vmem:[#allocation21_spill] sm:$0xff] %v2166_v50  ;;  %v867_v41 = vmul.f32 %v2166_v50, %v2166_v50  ;;  %v954_v5 = vadd.f32 %v953_v54, %v865_v60 }
 0x203   : > { %v2017_v62 = vpop.f32.mrb[25].mxu0  ;;  %v2174_v59 = vadd.f32 %v740_v3, %v2015_v61  ;;  %v918_v13 = vadd.f32 %v917_v63, %v866_v35 }
 0x204   : > { %v2182_v31 = vadd.f32 %v741_v7, %v2017_v62  ;;  %v746_v62 = vld [vmem:[%s1914_s27 + $0xf0] sm:$0xff]  ;;  %v955_v23 = vadd.f32 %v954_v5, %v867_v41 }
 0x205   : > { %v868_v56 = vmul.f32 %v2174_v59, %v2174_v59 }
 0x206   : > { %v2020_v0 = vpop.f32.mrb[26].mxu0  ;;  %2704 = vst [vmem:[#allocation22_spill] sm:$0xff] %v2182_v31  ;;  %v869_v7 = vmul.f32 %v2182_v31, %v2182_v31  ;;  %v779_v31 = vld [vmem:[%s1914_s27 + $0x1f8] sm:$0xff] }
 0x207   : > { %v2023_v2 = vpop.f32.mrb[27].mxu0  ;;  %v2188_v61 = vadd.f32 %v742_v58, %v2020_v0  ;;  %v747_v0 = vld [vmem:[%s1914_s27 + $0xf8] sm:$0xff] }
 0x208   : > { %v2194_v43 = vadd.f32 %v743_v26, %v2023_v2  ;;  %v956_v54 = vadd.f32 %v955_v23, %v869_v7 }
 0x209   : > { %v870_v58 = vmul.f32 %v2188_v61, %v2188_v61 }
 0x20a   : > { %v2034_v10 = vpop.f32.mrb[28].mxu0  ;;  %2705 = vst [vmem:[#allocation23_spill] sm:$0xff] %v2194_v43  ;;  %v871_v26 = vmul.f32 %v2194_v43, %v2194_v43 }
 0x20b   : > { %v2041_v14 = vpop.f32.mrb[29].mxu0  ;;  %v2200_v3 = vadd.f32 %v744_v33, %v2034_v10  ;;  %v749_v10 = vld [vmem:[%s1914_s27 + $0x108] sm:$0xff]  ;;  %v919_v33 = vadd.f32 %v918_v13, %v868_v56 }
 0x20c   : > { %v2206_v2 = vadd.f32 %v745_v37, %v2041_v14  ;;  %v750_v14 = vld [vmem:[%s1914_s27 + $0x110] sm:$0xff]  ;;  %v957_v5 = vadd.f32 %v956_v54, %v871_v26 }
 0x20d   : > { %v872_v34 = vmul.f32 %v2200_v3, %v2200_v3  ;;  %v920_v63 = vadd.f32 %v919_v33, %v870_v58 }
 0x20e   : > { %v2058_v24 = vpop.f32.mrb[30].mxu0  ;;  %2706 = vst [vmem:[#allocation24_spill] sm:$0xff] %v2206_v2  ;;  %v873_v41 = vmul.f32 %v2206_v2, %v2206_v2  ;;  %v767_v2 = vld [vmem:[%s1914_s27 + $0x198] sm:$0xff] }
 0x20f   : > { %v2067_v29 = vpop.f32.mrb[31].mxu0  ;;  %v2212_v21 = vadd.f32 %v746_v62, %v2058_v24  ;;  %v751_v24 = vld [vmem:[%s1914_s27 + $0x118] sm:$0xff]  ;;  %v752_v62 = vld [vmem:[%s1914_s27 + $0x120] sm:$0xff] }
 0x210   : > { %v2218_v30 = vadd.f32 %v747_v0, %v2067_v29  ;;  %v958_v26 = vadd.f32 %v957_v5, %v873_v41 }
 0x211   : > { %v874_v56 = vmul.f32 %v2212_v21, %v2212_v21 }
 0x212   : > { %v2086_v42 = vpop.f32.mrb[0].mxu1  ;;  %2707 = vst [vmem:[#allocation25_spill] sm:$0xff] %v2218_v30  ;;  %v875_v7 = vmul.f32 %v2218_v30, %v2218_v30 }
 0x213   : > { %v2093_v47 = vpop.f32.mrb[1].mxu1  ;;  %v2224_v35 = vadd.f32 %v748_v9, %v2086_v42  ;;  %v753_v42 = vld [vmem:[%s1914_s27 + $0x128] sm:$0xff] }
 0x214   : > { %v2230_v29 = vadd.f32 %v749_v10, %v2093_v47  ;;  %v754_v47 = vld [vmem:[%s1914_s27 + $0x130] sm:$0xff]  ;;  %v921_v10 = vadd.f32 %v920_v63, %v872_v34 }
 0x215   : > { %v876_v58 = vmul.f32 %v2224_v35, %v2224_v35 }
 0x216   : > { %v2113_v18 = vpop.f32.mrb[2].mxu1  ;;  %2708 = vst [vmem:[#allocation26_spill] sm:$0xff] %v2230_v29  ;;  %v877_v33 = vmul.f32 %v2230_v29, %v2230_v29  ;;  %v922_v54 = vadd.f32 %v921_v10, %v874_v56 }
 0x217   : > { %v2121_v25 = vpop.f32.mrb[3].mxu1  ;;  %v2236_v0 = vadd.f32 %v750_v14, %v2113_v18  ;;  %v755_v18 = vld [vmem:[%s1914_s27 + $0x138] sm:$0xff] }
 0x218   : > { %v2242_v9 = vadd.f32 %v751_v24, %v2121_v25  ;;  %v756_v24 = vld [vmem:[%s1914_s27 + $0x140] sm:$0xff]  ;;  %v923_v29 = vadd.f32 %v922_v54, %v876_v58 }
 0x219   : > { %v878_v34 = vmul.f32 %v2236_v0, %v2236_v0 }
 0x21a   : > { %v2141_v39 = vpop.f32.mrb[4].mxu1  ;;  %2709 = vst [vmem:[#allocation27_spill] sm:$0xff] %v2242_v9  ;;  %v879_v41 = vmul.f32 %v2242_v9, %v2242_v9  ;;  %v761_v9 = vld [vmem:[%s1914_s27 + $0x168] sm:$0xff] }
 0x21b   : > { %v2149_v46 = vpop.f32.mrb[5].mxu1  ;;  %v2248_v23 = vadd.f32 %v752_v62, %v2141_v39  ;;  %v757_v39 = vld [vmem:[%s1914_s27 + $0x148] sm:$0xff]  ;;  %v959_v62 = vadd.f32 %v958_v26, %v875_v7 }
 0x21c   : > { %v2254_v25 = vadd.f32 %v753_v42, %v2149_v46  ;;  %v758_v46 = vld [vmem:[%s1914_s27 + $0x150] sm:$0xff] }
 0x21d   : > { %v880_v56 = vmul.f32 %v2248_v23, %v2248_v23  ;;  %v960_v30 = vadd.f32 %v959_v62, %v877_v33  ;;  %v762_v62 = vld [vmem:[%s1914_s27 + $0x170] sm:$0xff] }
 0x21e   : > { %v2169_v20 = vpop.f32.mrb[6].mxu1  ;;  %2710 = vst [vmem:[#allocation28_spill] sm:$0xff] %v2254_v25  ;;  %v881_v7 = vmul.f32 %v2254_v25, %v2254_v25 }
 0x21f   : > { %v2177_v52 = vpop.f32.mrb[7].mxu1  ;;  %v2260_v63 = vadd.f32 %v754_v47, %v2169_v20  ;;  %v759_v20 = vld [vmem:[%s1914_s27 + $0x158] sm:$0xff] }
 0x220   : > { %v2266_v5 = vadd.f32 %v755_v18, %v2177_v52  ;;  %v760_v52 = vld [vmem:[%s1914_s27 + $0x160] sm:$0xff]  ;;  %v924_v18 = vadd.f32 %v923_v29, %v878_v34 }
 0x221   : > { %v882_v58 = vmul.f32 %v2260_v63, %v2260_v63 }
 0x222   : > { %v645_v44 = vpop.f32.mrb[8].mxu1  ;;  %2711 = vst [vmem:[#allocation29_spill] sm:$0xff] %v2266_v5 }
 0x223   : > { %v647_v4 = vpop.f32.mrb[9].mxu1  ;;  %v2271_v10 = vadd.f32 %v756_v24, %v645_v44  ;;  %v961_v44 = vadd.f32 %v960_v30, %v879_v41  ;;  %v883_v24 = vmul.f32 %v2266_v5, %v2266_v5  ;;  %v765_v5 = vld [vmem:[%s1914_s27 + $0x188] sm:$0xff] }
 0x224   : > { %v2276_v26 = vadd.f32 %v757_v39, %v647_v4  ;;  %v925_v4 = vadd.f32 %v924_v18, %v880_v56  ;;  %v763_v39 = vld [vmem:[%s1914_s27 + $0x178] sm:$0xff] }
 0x225   : > { %v884_v29 = vmul.f32 %v2271_v10, %v2271_v10 }
 0x226   : > { %v651_v60 = vpop.f32.mrb[10].mxu1  ;;  %2712 = vst [vmem:[#allocation30_spill] sm:$0xff] %v2276_v26  ;;  %v885_v30 = vmul.f32 %v2276_v26, %v2276_v26  ;;  %v766_v26 = vld [vmem:[%s1914_s27 + $0x190] sm:$0xff] }
 0x227   : > { %v653_v37 = vpop.f32.mrb[11].mxu1  ;;  %v2281_v54 = vadd.f32 %v758_v46, %v651_v60  ;;  %v962_v46 = vadd.f32 %v961_v44, %v881_v7 }
 0x228   : > { %v2286_v33 = vadd.f32 %v759_v20, %v653_v37  ;;  %v764_v37 = vld [vmem:[%s1914_s27 + $0x180] sm:$0xff]  ;;  %v926_v20 = vadd.f32 %v925_v4, %v882_v58 }
 0x229   : > { %v886_v56 = vmul.f32 %v2281_v54, %v2281_v54 }
 0x22a   : > { %v657_v13 = vpop.f32.mrb[12].mxu1  ;;  %2713 = vst [vmem:[#allocation31_spill] sm:$0xff] %v2286_v33 }
 0x22b   : > { %v659_v14 = vpop.f32.mrb[13].mxu1  ;;  %v2291_v34 = vadd.f32 %v760_v52, %v657_v13  ;;  %v963_v13 = vadd.f32 %v962_v46, %v883_v24  ;;  %v887_v52 = vmul.f32 %v2286_v33, %v2286_v33  ;;  %v768_v46 = vld [vmem:[%s1914_s27 + $0x1a0] sm:$0xff] }
 0x22c   : > { %v2296_v41 = vadd.f32 %v761_v9, %v659_v14  ;;  %v927_v9 = vadd.f32 %v926_v20, %v884_v29  ;;  %v769_v20 = vld [vmem:[%s1914_s27 + $0x1a8] sm:$0xff] }
 0x22d   : > { %v888_v14 = vmul.f32 %v2291_v34, %v2291_v34 }
 0x22e   : > { %v663_v42 = vpop.f32.mrb[14].mxu1  ;;  %2714 = vst [vmem:[#allocation32_spill] sm:$0xff] %v2296_v41  ;;  %v889_v24 = vmul.f32 %v2296_v41, %v2296_v41 }
 0x22f   : > { %v665_v47 = vpop.f32.mrb[15].mxu1  ;;  %v2301_v18 = vadd.f32 %v762_v62, %v663_v42  ;;  %v964_v42 = vadd.f32 %v963_v13, %v885_v30 }
 0x230   : > { %v2306_v7 = vadd.f32 %v763_v39, %v665_v47  ;;  %v928_v47 = vadd.f32 %v927_v9, %v886_v56 }
 0x231   : > { %v890_v39 = vmul.f32 %v2301_v18, %v2301_v18 }
 0x232   : > { %v669_v25 = vpop.f32.mrb[16].mxu1  ;;  %2715 = vst [vmem:[#allocation33_spill] sm:$0xff] %v2306_v7  ;;  %v929_v41 = vadd.f32 %v928_v47, %v888_v14  ;;  %v771_v14 = vld [vmem:[%s1914_s27 + $0x1b8] sm:$0xff] }
 0x233   : > { %v671_v60 = vpop.f32.mrb[17].mxu1  ;;  %v2311_v58 = vadd.f32 %v764_v37, %v669_v25  ;;  %v965_v25 = vadd.f32 %v964_v42, %v887_v52  ;;  %v891_v37 = vmul.f32 %v2306_v7, %v2306_v7  ;;  %v770_v52 = vld [vmem:[%s1914_s27 + $0x1b0] sm:$0xff] }
 0x234   : > { %v2316_v62 = vadd.f32 %v765_v5, %v671_v60  ;;  %v930_v42 = vadd.f32 %v929_v41, %v890_v39 }
 0x235   : > { %v892_v5 = vmul.f32 %v2311_v58, %v2311_v58  ;;  %v966_v9 = vadd.f32 %v965_v25, %v889_v24 }
 0x236   : > { %v675_v44 = vpop.f32.mrb[18].mxu1  ;;  %2716 = vst [vmem:[#allocation34_spill] sm:$0xff] %v2316_v62 }
 0x237   : > { %v677_v4 = vpop.f32.mrb[19].mxu1  ;;  %v2321_v29 = vadd.f32 %v766_v26, %v675_v44  ;;  %v893_v26 = vmul.f32 %v2316_v62, %v2316_v62 }
 0x238   : > { %v2326_v30 = vadd.f32 %v767_v2, %v677_v4  ;;  %v967_v4 = vadd.f32 %v966_v9, %v891_v37  ;;  %v772_v37 = vld [vmem:[%s1914_s27 + $0x1c0] sm:$0xff] }
 0x239   : > { %v894_v2 = vmul.f32 %v2321_v29, %v2321_v29 }
 0x23a   : > { %2717 = vst [vmem:[#allocation35_spill] sm:$0xff] %v2326_v30  ;;  %v681_v13 = vpop.f32.mrb[20].mxu1 }
 0x23b   : > { %v2330_v60 = vadd.f32 %v768_v46, %v681_v13  ;;  %v683_v56 = vpop.f32.mrb[21].mxu1  ;;  %v895_v46 = vmul.f32 %v2326_v30, %v2326_v30  ;;  %v931_v13 = vadd.f32 %v930_v42, %v892_v5  ;;  %v773_v5 = vld [vmem:[%s1914_s27 + $0x1c8] sm:$0xff] }
 0x23c   : > { %v2334_v44 = vadd.f32 %v769_v20, %v683_v56  ;;  %v968_v56 = vadd.f32 %v967_v4, %v893_v26 }
 0x23d   : > { %v896_v24 = vmul.f32 %v2330_v60, %v2330_v60  ;;  %v932_v9 = vadd.f32 %v931_v13, %v894_v2 }
 0x23e   : > { %2718 = vst [vmem:[#allocation36_spill] sm:$0xff] %v2334_v44  ;;  %v687_v47 = vpop.f32.mrb[22].mxu1  ;;  %v897_v41 = vmul.f32 %v2334_v44, %v2334_v44  ;;  %v969_v42 = vadd.f32 %v968_v56, %v895_v46  ;;  %v775_v44 = vld [vmem:[%s1914_s27 + $0x1d8] sm:$0xff] }
 0x23f   : > { %v2344_v25 = vadd.f32 %v770_v52, %v687_v47  ;;  %v689_v20 = vpop.f32.mrb[23].mxu1  ;;  %v933_v62 = vadd.f32 %v932_v9, %v896_v24 }
 0x240   : > { %v2348_v39 = vadd.f32 %v771_v14, %v689_v20  ;;  %v970_v4 = vadd.f32 %v969_v42, %v897_v41  ;;  %v774_v20 = vld [vmem:[%s1914_s27 + $0x1d0] sm:$0xff]  ;;  %v776_v42 = vld [vmem:[%s1914_s27 + $0x1e0] sm:$0xff] }
 0x241   : > { %v898_v30 = vmul.f32 %v2344_v25, %v2344_v25 }
 0x242   : > { %v899_v52 = vmul.f32 %v2348_v39, %v2348_v39  ;;  %v693_v47 = vpop.f32.mrb[24].mxu1 }
 0x243   : > { %v2356_v7 = vadd.f32 %v772_v37, %v693_v47  ;;  %v695_v26 = vpop.f32.mrb[25].mxu1  ;;  %v934_v2 = vadd.f32 %v933_v62, %v898_v30  ;;  %v777_v30 = vld [vmem:[%s1914_s27 + $0x1e8] sm:$0xff] }
 0x244   : > { %v2358_v14 = vadd.f32 %v773_v5, %v695_v26  ;;  %v971_v46 = vadd.f32 %v970_v4, %v899_v52 }
 0x245   : > { %v900_v13 = vmul.f32 %v2356_v7, %v2356_v7 }
 0x246   : > { %v901_v56 = vmul.f32 %v2358_v14, %v2358_v14  ;;  %v699_v33 = vpop.f32.mrb[26].mxu1 }
 0x247   : > { %v935_v24 = vadd.f32 %v934_v2, %v900_v13  ;;  %v2366_v37 = vadd.f32 %v774_v20, %v699_v33  ;;  %v701_v41 = vpop.f32.mrb[27].mxu1  ;;  %v778_v20 = vld [vmem:[%s1914_s27 + $0x1f0] sm:$0xff] }
 0x248   : > { %v972_v9 = vadd.f32 %v971_v46, %v901_v56  ;;  %v2368_v5 = vadd.f32 %v775_v44, %v701_v41 }
 0x249   : > { %v902_v62 = vmul.f32 %v2366_v37, %v2366_v37 }
 0x24a   : > { %v903_v52 = vmul.f32 %v2368_v5, %v2368_v5  ;;  %v705_v47 = vpop.f32.mrb[28].mxu1 }
 0x24b   : > { %v936_v26 = vadd.f32 %v935_v24, %v902_v62  ;;  %v840_v4 = vadd.f32 %v776_v42, %v705_v47  ;;  %v707_v43 = vpop.f32.mrb[29].mxu1 }
 0x24c   : > { %v973_v2 = vadd.f32 %v972_v9, %v903_v52  ;;  %v841_v33 = vadd.f32 %v777_v30, %v707_v43 }
 0x24d   : > { %v904_v13 = vmul.f32 %v840_v4, %v840_v4 }
 0x24e   : > { %v905_v46 = vmul.f32 %v841_v33, %v841_v33  ;;  %v711_v44 = vpop.f32.mrb[30].mxu1 }
 0x24f   : > { %v937_v56 = vadd.f32 %v936_v26, %v904_v13  ;;  %v842_v41 = vadd.f32 %v778_v20, %v711_v44  ;;  %v713_v50 = vpop.f32.mrb[31].mxu1 }
 0x250   : > { %v974_v1 = vadd.f32 %v973_v2, %v905_v46  ;;  %v843_v38 = vadd.f32 %v779_v31, %v713_v50  ;;  %v1706_v50 = vmov 1966171168   ;;  %v991_v2 = vlaneseq }
 0x251   : > { %v906_v28 = vmul.f32 %v842_v41, %v842_v41  ;;  %v989_v31 = vunpack.c.l.s4 %v1706_v50  ;;  %v2721_v50 = vld [vmem:[#allocation15_spill] sm:$0xff] }
 0x252   : > { %v907_v17 = vmul.f32 %v843_v38, %v843_v38 }
 0x253   : > { %v938_v48 = vadd.f32 %v937_v56, %v906_v28  ;;  %v992_v28 = vshrl.u32 %v991_v2, 7  ;;  %v2723_v2 = vld [vmem:[#allocation17_spill] sm:$0xff] }
 0x254   : > { %v975_v40 = vadd.f32 %v974_v1, %v907_v17  ;;  %v990_v17 = vunpack.c.0.s8 %v989_v31  ;;  %v2722_v31 = vld [vmem:[#allocation16_spill] sm:$0xff] }
 0x255   : > { %v939_v24 = vrot.slane %v938_v48, 4  ;;  %v1011_v44 = vsub.s32 1, %v992_v28 }
 0x256   : > { %v976_v42 = vrot.slane %v975_v40, 4 }
 0x257   : > { %v940_v62 = vadd.f32 %v939_v24, %v938_v48 }
 0x258   : > { %v977_v9 = vadd.f32 %v976_v42, %v975_v40  ;;  %v993_v40 = vsub.s32 %v990_v17, %v992_v28  ;;  %v2724_v17 = vld [vmem:[#allocation18_spill] sm:$0xff] }
 0x259   : > { %v941_v43 = vrot.slane %v940_v62, 2 }
 0x25a   : > { %v978_v30 = vrot.slane %v977_v9, 2 }
 0x25b   : > { %v942_v52 = vadd.f32 %v941_v43, %v940_v62  ;;  %v1007_v62 = vsub.s32 0, %v992_v28 }
 0x25c   : > { %v979_v47 = vadd.f32 %v978_v30, %v977_v9 }
 0x25d   : > { %v943_v32 = vrot.slane %v942_v52, 1 }
 0x25e   : > { %v980_v22 = vrot.slane %v979_v47, 1 }
 0x25f   : > { %v944_v26 = vadd.f32 %v943_v32, %v942_v52 }
 0x260   : > { %v981_v20 = vadd.f32 %v980_v22, %v979_v47  ;;  %v984_v22 = vld [vmem:[%s283_s26] sm:$0x3] }
 0x261   : > { %1531 = vrsqrt.f32 %v944_v26 }
 0x262   : > { %1533 = vrsqrt.f32 %v981_v20 }
 0x26b   : > { %v1532_v48 = vpop.eup %1531 }
 0x26c   : > { %v1534_v1 = vpop.eup %1533 }
 0x26d   : > { %v987_v13 = vcombine.low %v1532_v48, %v1534_v1  ;;  %v2725_v48 = vld [vmem:[#allocation19_spill] sm:$0xff]  ;;  %v2726_v1 = vld [vmem:[#allocation20_spill] sm:$0xff] }
 0x26f   : > { %v994_v32 = vrot.slane %v987_v13, %v993_v40 }
 0x271   : > { %v1001_v46 = vrot.slane %v994_v32, %v993_v40  ;;  %v2727_v32 = vld [vmem:[#allocation21_spill] sm:$0xff] }
 0x273   : > { %v1003_v56 = vmul.f32 %v1001_v46, %v984_v22  ;;  %v2728_v46 = vld [vmem:[#allocation22_spill] sm:$0xff] }
 0x275   : > { %v2382_v24 = vrot.slane %v1003_v56, %v1011_v44  ;;  %v2387_v9 = vrot.slane %v1003_v56, %v1007_v62  ;;  %v2729_v56 = vld [vmem:[#allocation23_spill] sm:$0xff] }
 0x277   : > { %v2385_v42 = vmul.f32 %v2382_v24, %v843_v38  ;;  %v1069_v43 = vmul.f32 %v2387_v9, %v2344_v25  ;;  %v2393_v30 = vmul.f32 %v2382_v24, %v2348_v39  ;;  %v1071_v52 = vmul.f32 %v2387_v9, %v2356_v7 }
 0x278   : > { %v2399_v47 = vmul.f32 %v2382_v24, %v2358_v14  ;;  %v1073_v38 = vmul.f32 %v2387_v9, %v2366_v37  ;;  %v2405_v26 = vmul.f32 %v2382_v24, %v2368_v5  ;;  %v1075_v25 = vmul.f32 %v2387_v9, %v840_v4 }
 0x279   : > { %v2409_v20 = vmul.f32 %v2382_v24, %v841_v33  ;;  %v1077_v39 = vmul.f32 %v2387_v9, %v842_v41  ;;  %v1047_v7 = vmul.f32 %v2387_v9, %v2224_v35  ;;  %v1015_v14 = vmul.f32 %v2387_v9, %v2036_v11  ;;  %v2720_v41 = vld [vmem:[#allocation14_spill] sm:$0xff] }
 0x27a   : > { %v1049_v37 = vmul.f32 %v2387_v9, %v2236_v0  ;;  %v1017_v5 = vmul.f32 %v2387_v9, %v2028_v6  ;;  %v1051_v4 = vmul.f32 %v2387_v9, %v2248_v23  ;;  %v1019_v33 = vmul.f32 %v2387_v9, %v2038_v12 }
 0x27b   : > { %1143 = vxpose.xlu0.b32.start [1/16] %v1047_v7, 128  ;;  %1079 = vxpose.xlu1.b32.start [1/16] %v1015_v14, 128  ;;  %v1053_v11 = vmul.f32 %v2387_v9, %v2260_v63  ;;  %v1021_v35 = vmul.f32 %v2387_v9, %v2050_v19  ;;  %v1055_v6 = vmul.f32 %v2387_v9, %v2271_v10 }
 0x27c   : > { %v1023_v0 = vmul.f32 %v2387_v9, %v2064_v27  ;;  %v1057_v12 = vmul.f32 %v2387_v9, %v2281_v54  ;;  %v1025_v23 = vmul.f32 %v2387_v9, %v2078_v36  ;;  %v1059_v19 = vmul.f32 %v2387_v9, %v2291_v34 }
 0x27d   : > { %v1027_v63 = vmul.f32 %v2387_v9, %v2090_v45  ;;  %v1061_v27 = vmul.f32 %v2387_v9, %v2301_v18  ;;  %v1029_v10 = vmul.f32 %v2387_v9, %v2104_v49  ;;  %v1063_v36 = vmul.f32 %v2387_v9, %v2311_v58 }
 0x27e   : > { %v1031_v54 = vmul.f32 %v2387_v9, %v2118_v51  ;;  %v1065_v45 = vmul.f32 %v2387_v9, %v2321_v29  ;;  %v1033_v34 = vmul.f32 %v2387_v9, %v2132_v53  ;;  %v1067_v49 = vmul.f32 %v2387_v9, %v2330_v60 }
 0x27f   : > { %1144 = vxpose.xlu0.b32.cont [2/16] %v1049_v37, 128  ;;  %1080 = vxpose.xlu1.b32.cont [2/16] %v1017_v5, 128  ;;  %v1035_v18 = vmul.f32 %v2387_v9, %v2146_v55  ;;  %v1037_v51 = vmul.f32 %v2387_v9, %v2160_v57  ;;  %v1039_v58 = vmul.f32 %v2387_v9, %v2174_v59  ;;  %v2733_v37 = vld [vmem:[#allocation27_spill] sm:$0xff] }
 0x280   : > { %v1041_v53 = vmul.f32 %v2387_v9, %v2188_v61  ;;  %v1043_v55 = vmul.f32 %v2387_v9, %v2200_v3  ;;  %v1045_v57 = vmul.f32 %v2387_v9, %v2212_v21  ;;  %v1016_v59 = vmul.f32 %v2382_v24, %v2043_v15  ;;  %v2719_v3 = vld [vmem:[#allocation13_spill] sm:$0xff]  ;;  %v2730_v9 = vld [vmem:[#allocation24_spill] sm:$0xff] }
 0x281   : > { %v1018_v29 = vmul.f32 %v2382_v24, %v2031_v8  ;;  %v1020_v61 = vmul.f32 %v2382_v24, %v2045_v16  ;;  %v1022_v60 = vmul.f32 %v2382_v24, %v2719_v3  ;;  %v1024_v21 = vmul.f32 %v2382_v24, %v2720_v41  ;;  %v2740_v3 = vld [vmem:[#allocation34_spill] sm:$0xff] }
 0x282   : > { %v1026_v15 = vmul.f32 %v2382_v24, %v2721_v50  ;;  %v1028_v8 = vmul.f32 %v2382_v24, %v2722_v31  ;;  %v1030_v16 = vmul.f32 %v2382_v24, %v2723_v2  ;;  %v1032_v28 = vmul.f32 %v2382_v24, %v2724_v17  ;;  %v2741_v50 = vld [vmem:[#allocation35_spill] sm:$0xff]  ;;  %v2742_v2 = vld [vmem:[#allocation36_spill] sm:$0xff] }
 0x283   : > { %1145 = vxpose.xlu0.b32.cont [3/16] %v1051_v4, 128  ;;  %1081 = vxpose.xlu1.b32.cont [3/16] %v1019_v33, 128  ;;  %v1034_v40 = vmul.f32 %v2382_v24, %v2725_v48  ;;  %v1036_v13 = vmul.f32 %v2382_v24, %v2726_v1  ;;  %v1038_v22 = vmul.f32 %v2382_v24, %v2727_v32 }
 0x284   : > { %v1040_v44 = vmul.f32 %v2382_v24, %v2728_v46  ;;  %v1042_v62 = vmul.f32 %v2382_v24, %v2729_v56  ;;  %v1050_v5 = vmul.f32 %v2382_v24, %v2733_v37 }
 0x287   : > { %1146 = vxpose.xlu0.b32.cont [4/16] %v1053_v11, 128  ;;  %1082 = vxpose.xlu1.b32.cont [4/16] %v1021_v35, 128  ;;  %v2734_v11 = vld [vmem:[#allocation28_spill] sm:$0xff] }
 0x288   : > { %v1052_v35 = vmul.f32 %v2382_v24, %v2734_v11 }
 0x28b   : > { %1147 = vxpose.xlu0.b32.cont [5/16] %v1055_v6, 128  ;;  %1083 = vxpose.xlu1.b32.cont [5/16] %v1023_v0, 128 }
 0x28f   : > { %1148 = vxpose.xlu0.b32.cont [6/16] %v1057_v12, 128  ;;  %1084 = vxpose.xlu1.b32.cont [6/16] %v1025_v23, 128  ;;  %v2735_v12 = vld [vmem:[#allocation29_spill] sm:$0xff] }
 0x290   : > { %v1054_v23 = vmul.f32 %v2382_v24, %v2735_v12 }
 0x293   : > { %1149 = vxpose.xlu0.b32.cont [7/16] %v1059_v19, 128  ;;  %1085 = vxpose.xlu1.b32.cont [7/16] %v1027_v63, 128 }
 0x297   : > { %1150 = vxpose.xlu0.b32.cont [8/16] %v1061_v27, 128  ;;  %1086 = vxpose.xlu1.b32.cont [8/16] %v1029_v10, 128  ;;  %v2736_v27 = vld [vmem:[#allocation30_spill] sm:$0xff] }
 0x298   : > { %v1056_v10 = vmul.f32 %v2382_v24, %v2736_v27 }
 0x29b   : > { %1151 = vxpose.xlu0.b32.cont [9/16] %v1063_v36, 128  ;;  %1087 = vxpose.xlu1.b32.cont [9/16] %v1031_v54, 128 }
 0x29f   : > { %1152 = vxpose.xlu0.b32.cont [10/16] %v1065_v45, 128  ;;  %1088 = vxpose.xlu1.b32.cont [10/16] %v1033_v34, 128  ;;  %v2737_v45 = vld [vmem:[#allocation31_spill] sm:$0xff] }
 0x2a0   : > { %v1058_v34 = vmul.f32 %v2382_v24, %v2737_v45 }
 0x2a3   : > { %1153 = vxpose.xlu0.b32.cont [11/16] %v1067_v49, 128  ;;  %1089 = vxpose.xlu1.b32.cont [11/16] %v1035_v18, 128 }
 0x2a7   : > { %1154 = vxpose.xlu0.b32.cont [12/16] %v1069_v43, 128  ;;  %1090 = vxpose.xlu1.b32.cont [12/16] %v1037_v51, 128  ;;  %v1044_v43 = vmul.f32 %v2382_v24, %v2730_v9  ;;  %v2738_v51 = vld [vmem:[#allocation32_spill] sm:$0xff] }
 0x2ab   : > { %1155 = vxpose.xlu0.b32.cont [13/16] %v1071_v52, 128  ;;  %1091 = vxpose.xlu1.b32.cont [13/16] %v1039_v58, 128  ;;  %v2731_v52 = vld [vmem:[#allocation25_spill] sm:$0xff]  ;;  %v1060_v58 = vmul.f32 %v2382_v24, %v2738_v51 }
 0x2af   : > { %1156 = vxpose.xlu0.b32.cont [14/16] %v1073_v38, 128  ;;  %1092 = vxpose.xlu1.b32.cont [14/16] %v1041_v53, 128  ;;  %v1046_v38 = vmul.f32 %v2382_v24, %v2731_v52 }
 0x2b3   : > { %1157 = vxpose.xlu0.b32.cont [15/16] %v1075_v25, 128  ;;  %1093 = vxpose.xlu1.b32.cont [15/16] %v1043_v55, 128  ;;  %v2732_v25 = vld [vmem:[#allocation26_spill] sm:$0xff] }
 0x2b7   : > { %1158 = vxpose.xlu0.b32.end [16/16] %v1077_v39, 128  ;;  %1094 = vxpose.xlu1.b32.end [16/16] %v1045_v57, 128  ;;  %v1048_v39 = vmul.f32 %v2382_v24, %v2732_v25  ;;  %v2739_v57 = vld [vmem:[#allocation33_spill] sm:$0xff] }
 0x2bb   : > { %1111 = vxpose.xlu1.b32.start [1/16] %v1016_v59, 128  ;;  %v1062_v59 = vmul.f32 %v2382_v24, %v2739_v57 }
 0x2bf   : > { %1112 = vxpose.xlu1.b32.cont [2/16] %v1018_v29, 128 }
 0x2c3   : > { %1113 = vxpose.xlu1.b32.cont [3/16] %v1020_v61, 128 }
 0x2c7   : > { %1114 = vxpose.xlu1.b32.cont [4/16] %v1022_v60, 128  ;;  %v1064_v60 = vmul.f32 %v2382_v24, %v2740_v3 }
 0x2cb   : > { %1115 = vxpose.xlu1.b32.cont [5/16] %v1024_v21, 128 }
 0x2cf   : > { %1116 = vxpose.xlu1.b32.cont [6/16] %v1026_v15, 128  ;;  %v1066_v15 = vmul.f32 %v2382_v24, %v2741_v50 }
 0x2d3   : > { %1117 = vxpose.xlu1.b32.cont [7/16] %v1028_v8, 128 }
 0x2d7   : > { %1118 = vxpose.xlu1.b32.cont [8/16] %v1030_v16, 128  ;;  %v1068_v16 = vmul.f32 %v2382_v24, %v2742_v2 }
 0x2db   : > { %1119 = vxpose.xlu1.b32.cont [9/16] %v1032_v28, 128 }
 0x2df   : > { %1120 = vxpose.xlu1.b32.cont [10/16] %v1034_v40, 128 }
 0x2e3   : > { %1121 = vxpose.xlu1.b32.cont [11/16] %v1036_v13, 128 }
 0x2e7   : > { %1122 = vxpose.xlu1.b32.cont [12/16] %v1038_v22, 128 }
 0x2eb   : > { %1123 = vxpose.xlu1.b32.cont [13/16] %v1040_v44, 128 }
 0x2ef   : > { %1124 = vxpose.xlu1.b32.cont [14/16] %v1042_v62, 128 }
 0x2f3   : > { %1125 = vxpose.xlu1.b32.cont [15/16] %v1044_v43, 128 }
 0x2f7   : > { %1126 = vxpose.xlu1.b32.end [16/16] %v1046_v38, 128 }
 0x2fb   : > { %1175 = vxpose.xlu1.b32.start [1/16] %v1048_v39, 128  ;;  %v1095_v7 = vpop.trf.xlu1  ;;  %v1159_v14 = vpop.trf.xlu0 }
 0x2fc   : > { %1207 = vst [vmem:[%s2502_s30] sm:$0xff] %v1095_v7  ;;  %1208 = vst [vmem:[%s2502_s30 + $0x8] sm:$0xff] %v1159_v14 }
 0x2ff   : > { %1176 = vxpose.xlu1.b32.cont [2/16] %v1050_v5, 128  ;;  %v1096_v4 = vpop.trf.xlu1  ;;  %v1160_v33 = vpop.trf.xlu0 }
 0x300   : > { %1209 = vst [vmem:[%s2502_s30 + $0x10] sm:$0xff] %v1096_v4  ;;  %1210 = vst [vmem:[%s2502_s30 + $0x18] sm:$0xff] %v1160_v33 }
 0x303   : > { %1177 = vxpose.xlu1.b32.cont [3/16] %v1052_v35, 128  ;;  %v1097_v6 = vpop.trf.xlu1  ;;  %v1161_v0 = vpop.trf.xlu0 }
 0x304   : > { %1211 = vst [vmem:[%s2502_s30 + $0x20] sm:$0xff] %v1097_v6  ;;  %1212 = vst [vmem:[%s2502_s30 + $0x28] sm:$0xff] %v1161_v0 }
 0x307   : > { %1178 = vxpose.xlu1.b32.cont [4/16] %v1054_v23, 128  ;;  %v1098_v19 = vpop.trf.xlu1  ;;  %v1162_v63 = vpop.trf.xlu0 }
 0x308   : > { %1213 = vst [vmem:[%s2502_s30 + $0x30] sm:$0xff] %v1098_v19  ;;  %1214 = vst [vmem:[%s2502_s30 + $0x38] sm:$0xff] %v1162_v63 }
 0x30b   : > { %1179 = vxpose.xlu1.b32.cont [5/16] %v1056_v10, 128  ;;  %v1099_v36 = vpop.trf.xlu1  ;;  %v1163_v54 = vpop.trf.xlu0 }
 0x30c   : > { %1215 = vst [vmem:[%s2502_s30 + $0x40] sm:$0xff] %v1099_v36  ;;  %1216 = vst [vmem:[%s2502_s30 + $0x48] sm:$0xff] %v1163_v54 }
 0x30f   : > { %1180 = vxpose.xlu1.b32.cont [6/16] %v1058_v34, 128  ;;  %v1100_v49 = vpop.trf.xlu1  ;;  %v1164_v18 = vpop.trf.xlu0 }
 0x310   : > { %1217 = vst [vmem:[%s2502_s30 + $0x50] sm:$0xff] %v1100_v49  ;;  %1218 = vst [vmem:[%s2502_s30 + $0x58] sm:$0xff] %v1164_v18 }
 0x313   : > { %1181 = vxpose.xlu1.b32.cont [7/16] %v1060_v58, 128  ;;  %v1101_v53 = vpop.trf.xlu1  ;;  %v1165_v55 = vpop.trf.xlu0 }
 0x314   : > { %1219 = vst [vmem:[%s2502_s30 + $0x60] sm:$0xff] %v1101_v53  ;;  %1220 = vst [vmem:[%s2502_s30 + $0x68] sm:$0xff] %v1165_v55 }
 0x317   : > { %1182 = vxpose.xlu1.b32.cont [8/16] %v1062_v59, 128  ;;  %v1102_v29 = vpop.trf.xlu1  ;;  %v1166_v61 = vpop.trf.xlu0 }
 0x318   : > { %1221 = vst [vmem:[%s2502_s30 + $0x70] sm:$0xff] %v1102_v29  ;;  %1222 = vst [vmem:[%s2502_s30 + $0x78] sm:$0xff] %v1166_v61 }
 0x31b   : > { %1183 = vxpose.xlu1.b32.cont [9/16] %v1064_v60, 128  ;;  %v1103_v41 = vpop.trf.xlu1  ;;  %v1167_v21 = vpop.trf.xlu0 }
 0x31c   : > { %1223 = vst [vmem:[%s2502_s30 + $0x80] sm:$0xff] %v1103_v41  ;;  %1224 = vst [vmem:[%s2502_s30 + $0x88] sm:$0xff] %v1167_v21 }
 0x31f   : > { %1184 = vxpose.xlu1.b32.cont [10/16] %v1066_v15, 128  ;;  %v1104_v31 = vpop.trf.xlu1  ;;  %v1168_v8 = vpop.trf.xlu0 }
 0x320   : > { %1225 = vst [vmem:[%s2502_s30 + $0x90] sm:$0xff] %v1104_v31  ;;  %1226 = vst [vmem:[%s2502_s30 + $0x98] sm:$0xff] %v1168_v8 }
 0x323   : > { %1185 = vxpose.xlu1.b32.cont [11/16] %v1068_v16, 128  ;;  %v1105_v17 = vpop.trf.xlu1  ;;  %v1169_v28 = vpop.trf.xlu0 }
 0x324   : > { %1227 = vst [vmem:[%s2502_s30 + $0xa0] sm:$0xff] %v1105_v17  ;;  %1228 = vst [vmem:[%s2502_s30 + $0xa8] sm:$0xff] %v1169_v28 }
 0x327   : > { %1186 = vxpose.xlu1.b32.cont [12/16] %v2393_v30, 128  ;;  %v1106_v48 = vpop.trf.xlu1  ;;  %v1170_v40 = vpop.trf.xlu0 }
 0x328   : > { %1229 = vst [vmem:[%s2502_s30 + $0xb0] sm:$0xff] %v1106_v48  ;;  %1230 = vst [vmem:[%s2502_s30 + $0xb8] sm:$0xff] %v1170_v40 }
 0x32b   : > { %1187 = vxpose.xlu1.b32.cont [13/16] %v2399_v47, 128  ;;  %v1107_v1 = vpop.trf.xlu1  ;;  %v1171_v13 = vpop.trf.xlu0 }
 0x32c   : > { %1231 = vst [vmem:[%s2502_s30 + $0xc0] sm:$0xff] %v1107_v1  ;;  %1232 = vst [vmem:[%s2502_s30 + $0xc8] sm:$0xff] %v1171_v13 }
 0x32f   : > { %1188 = vxpose.xlu1.b32.cont [14/16] %v2405_v26, 128  ;;  %v1108_v24 = vpop.trf.xlu1  ;;  %v1172_v32 = vpop.trf.xlu0 }
 0x330   : > { %1233 = vst [vmem:[%s2502_s30 + $0xd0] sm:$0xff] %v1108_v24  ;;  %1234 = vst [vmem:[%s2502_s30 + $0xd8] sm:$0xff] %v1172_v32 }
 0x333   : > { %1189 = vxpose.xlu1.b32.cont [15/16] %v2409_v20, 128  ;;  %v1109_v30 = vpop.trf.xlu1  ;;  %v1173_v47 = vpop.trf.xlu0 }
 0x334   : > { %1235 = vst [vmem:[%s2502_s30 + $0xe0] sm:$0xff] %v1109_v30  ;;  %1236 = vst [vmem:[%s2502_s30 + $0xe8] sm:$0xff] %v1173_v47 }
 0x337   : > { %1190 = vxpose.xlu1.b32.end [16/16] %v2385_v42, 128  ;;  %v1110_v22 = vpop.trf.xlu1  ;;  %v1174_v26 = vpop.trf.xlu0 }
 0x338   : > { %1237 = vst [vmem:[%s2502_s30 + $0xf0] sm:$0xff] %v1110_v22  ;;  %1238 = vst [vmem:[%s2502_s30 + $0xf8] sm:$0xff] %v1174_v26 }
 0x33b   : > { %v1127_v46 = vpop.trf.xlu1 }
 0x33c   : > { %1239 = vst [vmem:[%s2502_s30 + $0x100] sm:$0xff] %v1127_v46 }
 0x33f   : > { %v1128_v44 = vpop.trf.xlu1 }
 0x340   : > { %1241 = vst [vmem:[%s2502_s30 + $0x110] sm:$0xff] %v1128_v44 }
 0x343   : > { %v1129_v20 = vpop.trf.xlu1 }
 0x344   : > { %1243 = vst [vmem:[%s2502_s30 + $0x120] sm:$0xff] %v1129_v20 }
 0x347   : > { %v1130_v56 = vpop.trf.xlu1 }
 0x348   : > { %1245 = vst [vmem:[%s2502_s30 + $0x130] sm:$0xff] %v1130_v56 }
 0x34b   : > { %v1131_v42 = vpop.trf.xlu1 }
 0x34c   : > { %1247 = vst [vmem:[%s2502_s30 + $0x140] sm:$0xff] %v1131_v42 }
 0x34f   : > { %v1132_v62 = vpop.trf.xlu1 }
 0x350   : > { %1249 = vst [vmem:[%s2502_s30 + $0x150] sm:$0xff] %v1132_v62 }
 0x353   : > { %v1133_v9 = vpop.trf.xlu1 }
 0x354   : > { %1251 = vst [vmem:[%s2502_s30 + $0x160] sm:$0xff] %v1133_v9 }
 0x357   : > { %v1134_v43 = vpop.trf.xlu1 }
 0x358   : > { %1253 = vst [vmem:[%s2502_s30 + $0x170] sm:$0xff] %v1134_v43 }
 0x35b   : > { %v1135_v52 = vpop.trf.xlu1 }
 0x35c   : > { %1255 = vst [vmem:[%s2502_s30 + $0x180] sm:$0xff] %v1135_v52 }
 0x35f   : > { %v1136_v38 = vpop.trf.xlu1 }
 0x360   : > { %1257 = vst [vmem:[%s2502_s30 + $0x190] sm:$0xff] %v1136_v38 }
 0x363   : > { %v1137_v25 = vpop.trf.xlu1 }
 0x364   : > { %1259 = vst [vmem:[%s2502_s30 + $0x1a0] sm:$0xff] %v1137_v25 }
 0x367   : > { %v1138_v39 = vpop.trf.xlu1 }
 0x368   : > { %1261 = vst [vmem:[%s2502_s30 + $0x1b0] sm:$0xff] %v1138_v39 }
 0x36b   : > { %v1139_v7 = vpop.trf.xlu1 }
 0x36c   : > { %1263 = vst [vmem:[%s2502_s30 + $0x1c0] sm:$0xff] %v1139_v7 }
 0x36f   : > { %v1140_v14 = vpop.trf.xlu1 }
 0x370   : > { %1265 = vst [vmem:[%s2502_s30 + $0x1d0] sm:$0xff] %v1140_v14 }
 0x373   : > { %v1141_v37 = vpop.trf.xlu1 }
 0x374   : > { %1267 = vst [vmem:[%s2502_s30 + $0x1e0] sm:$0xff] %v1141_v37 }
 0x377   : > { %v1142_v5 = vpop.trf.xlu1 }
 0x378   : > { %1269 = vst [vmem:[%s2502_s30 + $0x1f0] sm:$0xff] %v1142_v5 }
 0x37b   : > { %v1191_v4 = vpop.trf.xlu1 }
 0x37c   : > { %1240 = vst [vmem:[%s2502_s30 + $0x108] sm:$0xff] %v1191_v4 }
 0x37f   : > { %v1192_v33 = vpop.trf.xlu1 }
 0x380   : > { %1242 = vst [vmem:[%s2502_s30 + $0x118] sm:$0xff] %v1192_v33 }
 0x383   : > { %v1193_v11 = vpop.trf.xlu1 }
 0x384   : > { %1244 = vst [vmem:[%s2502_s30 + $0x128] sm:$0xff] %v1193_v11 }
 0x387   : > { %v1194_v35 = vpop.trf.xlu1 }
 0x388   : > { %1246 = vst [vmem:[%s2502_s30 + $0x138] sm:$0xff] %v1194_v35 }
 0x38b   : > { %v1195_v6 = vpop.trf.xlu1 }
 0x38c   : > { %1248 = vst [vmem:[%s2502_s30 + $0x148] sm:$0xff] %v1195_v6 }
 0x38f   : > { %v1196_v0 = vpop.trf.xlu1 }
 0x390   : > { %1250 = vst [vmem:[%s2502_s30 + $0x158] sm:$0xff] %v1196_v0 }
 0x393   : > { %v1197_v12 = vpop.trf.xlu1 }
 0x394   : > { %1252 = vst [vmem:[%s2502_s30 + $0x168] sm:$0xff] %v1197_v12 }
 0x397   : > { %v1198_v23 = vpop.trf.xlu1 }
 0x398   : > { %1254 = vst [vmem:[%s2502_s30 + $0x178] sm:$0xff] %v1198_v23 }
 0x39b   : > { %v1199_v19 = vpop.trf.xlu1 }
 0x39c   : > { %1256 = vst [vmem:[%s2502_s30 + $0x188] sm:$0xff] %v1199_v19 }
 0x39f   : > { %v1200_v63 = vpop.trf.xlu1 }
 0x3a0   : > { %1258 = vst [vmem:[%s2502_s30 + $0x198] sm:$0xff] %v1200_v63 }
 0x3a3   : > { %v1201_v27 = vpop.trf.xlu1 }
 0x3a4   : > { %1260 = vst [vmem:[%s2502_s30 + $0x1a8] sm:$0xff] %v1201_v27 }
 0x3a7   : > { %v1202_v10 = vpop.trf.xlu1 }
 0x3a8   : > { %1262 = vst [vmem:[%s2502_s30 + $0x1b8] sm:$0xff] %v1202_v10 }
 0x3ab   : > { %v1203_v36 = vpop.trf.xlu1 }
 0x3ac   : > { %1264 = vst [vmem:[%s2502_s30 + $0x1c8] sm:$0xff] %v1203_v36 }
 0x3af   : > { %v1204_v54 = vpop.trf.xlu1 }
 0x3b0   : > { %1266 = vst [vmem:[%s2502_s30 + $0x1d8] sm:$0xff] %v1204_v54 }
 0x3b3   : > { %v1205_v45 = vpop.trf.xlu1 }
 0x3b4   : > { %1268 = vst [vmem:[%s2502_s30 + $0x1e8] sm:$0xff] %v1205_v45 }
 0x3b7   : > { %v1206_v34 = vpop.trf.xlu1 }
 0x3b8   : > { %1270 = vst [vmem:[%s2502_s30 + $0x1f8] sm:$0xff] %v1206_v34 }
 0x3b9   : > { %1636 = shalt.err (!%p1633_p6)
}
 0x3ba   : > { %s1637_s27 = scalar_lea.hbm %s2597_s14, 8192  ;;  %s1641_s8 = scalar_lea.hbm %s2648_s4, 16384 }
 0x3bb   : > { %p1638_p5 = scmp.ne.s32.totalorder %s2597_s14, %s1637_s27  ;;  %p1642_p10 = scmp.lt.u32.totalorder %s2597_s14, %s2648_s4 }
 0x3bc   : > { %p1643_p9 = scmp.lt.u32.totalorder %s1641_s8, %s1637_s27  ;;  %p1645_p4 = scmp.lt.u32.totalorder %s1637_s27, %s2597_s14 }
 0x3bd   : > { %p1639_p2 = pnand %p1638_p5, %p2743_p0 }
 0x3be   : > { %p1644_p12 = por %p1643_p9, %p1642_p10 }
 0x3bf   : > { %p1640_p7 = pneg %p1639_p2 }
 0x3c0   : > { %p1646_p11 = por %p1645_p4, %p1644_p12 }
 0x3c2   : > { %p1647_p13 = pnand %p1646_p11, %p1640_p7 }
 0x3c4   : > { %1650 = shalt.err (!%p1647_p13)
}
 0x3c5   : > { %s1708_s26 = smov 256   ;;  %s1709_s30 = smov 16  }
 0x3c6   : > { %1468 = dma.vmem_to_hbm [thread:$0]  (%p2743_p0), %s2599_s10, 8192, %s2597_s14, %s1272_s13, %s1708_s26, %s1708_s26, %s1709_s30  }
 0x3c7 PF: > { %s1301_s21 = sand.u32 1, %s1685_s15   ;;  %p2744_p3 = scmp.ne.s32.totalorder %s2685_s5, 0 }
 0x3c8   : > { %p2745_p8 = scmp.ge.s32.totalorder %s1697_s18, 2  ;;  %s1302_s11 = scalar_lea.sflag [#allocation4], %s1301_s21 }
 0x3ca   : > { %p1482_p1 = pnand %p2745_p8, %p2744_p3 }
 0x3cc   : > { %1680 = dma.done.wait (!%p1482_p1), %s1302_s11, 8192  }
 0x3cd   : > { %1682 = vsyncadd (!%p1482_p1), %s1302_s11, 4294959104  ;;  %p18_p6 = scmp.ge.s32.totalorder %s1756_s19, 4   ;;  %s2746_s15 = smov %s1689_s16 }
 0x3ce   : > { %s2747_s16 = smov %s1693_s17  ;;  %s2748_s17 = smov %s1767_s22 }
 0x3cf   : > { %s2749_s18 = smov %s1756_s19  ;;  %20 = sbr.rel (!%p18_p6) target bundleno = 8 (0x8), region = 99 }
 0x3d6   :  { %1307 = vsyncpa [#allocation3], 1 }
 0x3d7   :  { %1309 = vsyncpa [#allocation3 + $0x1], 1 }
 0x3d8   :  { %1310 = vsyncpa [#allocation6], 1 }
 0x3d9   :  { %1311 = vsyncpa [#allocation4], 1 }
 0x3da   :  { %1313 = vsyncpa [#allocation4 + $0x1], 1 }

</bundles_post_ra>
